<compile_context>
chip_gen: v7x
topology: tpu7x:2x2x1
jax: 0.10.0
libtpu: 0.0.40
codegen_flags: <defaults>
</compile_context>

<pallas_src>
import functools

import jax
import jax.numpy as jnp
from jax import lax
from jax.experimental import pallas as pl
from jax.experimental.pallas import tpu as pltpu

BINARIZER_THRESHOLD = 5e-3  # piggyback DEFAULT_THRESHOLD


def _pbgru_kernel(x_ref, wih_ref, whh_ref, bih_ref, bhh_ref,
                  wlin_ref, blin_ref, mih_ref, mhh_ref, mlin_ref,
                  out_ref,
                  gi_s, h_all_s, h_carry, wih_ms, whh_ms, wlin_ms):
    """One time-chunk of the GRU recurrence + linear head (grid over time chunks).

    x_ref:   (Tc*Bp, I)  f32, time-major flattened chunk of the input.
    w*_ref:  bf16 weights pre-transposed for right-multiplication, gate axes padded to Hp.
    m*_ref:  bf16 pre-binarized {0,1} piggyback masks, same layout as the weights.
    out_ref: (Tc*Bp, Op) f32, lane-dense (Op multiple of 128).
    gi_s:    (Tc, Bp, 3Hp) f32 scratch — hoisted input projection for the chunk.
    h_all_s: (Tc, Bp, Hp)  f32 scratch — hidden states feeding the hoisted head matmul.
    h_carry: (Bp, Hp)      f32 scratch — hidden state carried across time chunks.
    w*_ms:   bf16 scratch  — masked weights, built once on the first chunk and reused.
    """
    Tc, Bp, H3 = gi_s.shape
    Hp = h_all_s.shape[2]

    @pl.when(pl.program_id(0) == 0)
    def _init():
        h_carry[...] = jnp.zeros_like(h_carry)
        # piggyback binarizer masking: W * (mask_real > thr). Masks arrive pre-binarized
        # as bf16 {0,1}, so the multiply is exact. Built once, reused for every chunk.
        wih_ms[...] = wih_ref[...] * mih_ref[...]
        whh_ms[...] = whh_ref[...] * mhh_ref[...]
        wlin_ms[...] = wlin_ref[...] * mlin_ref[...]

    # --- hoisted input projection: one (Tc*Bp, I) x (I, 3Hp) bf16 matmul, f32 accum ---
    x_bf = x_ref[...].astype(jnp.bfloat16)
    gi_all = jnp.dot(x_bf, wih_ms[...], preferred_element_type=jnp.float32) + bih_ref[...]
    gi_s[...] = gi_all.reshape(Tc, Bp, H3)        # Bp mult of 8, 3Hp mult of 128 -> trivial

    # --- bias broadcast hoisted out of the time loop ---
    bhh = jnp.broadcast_to(bhh_ref[...], (Bp, H3))

    def step(t, h_prev):
        gi = gi_s[t]                                                    # (Bp, 3Hp)
        gh = jnp.dot(h_prev.astype(jnp.bfloat16), whh_ms[...],
                     preferred_element_type=jnp.float32) + bhh
        # gate slices are 128-lane aligned because H is padded to Hp (multiple of 128);
        # gate math stays f32 (accurate on all gens, incl. v5e's f32-only VPU/EUP).
        r = jax.nn.sigmoid(gi[:, 0 * Hp:1 * Hp] + gh[:, 0 * Hp:1 * Hp])
        z = jax.nn.sigmoid(gi[:, 1 * Hp:2 * Hp] + gh[:, 1 * Hp:2 * Hp])
        n = jnp.tanh(gi[:, 2 * Hp:3 * Hp] + r * gh[:, 2 * Hp:3 * Hp])
        h_new = (1.0 - z) * n + z * h_prev
        h_all_s[t] = h_new
        return h_new

    # h carried in vregs through the loop; bounded unroll keeps code size sane.
    h_last = lax.fori_loop(0, Tc, step, h_carry[...], unroll=4)
    h_carry[...] = h_last                        # persist across time chunks

    # --- hoisted linear head: one bf16 matmul + one lane-dense store per chunk ---
    h_flat = h_all_s[...].reshape(Tc * Bp, Hp).astype(jnp.bfloat16)
    out_ref[...] = (jnp.dot(h_flat, wlin_ms[...], preferred_element_type=jnp.float32)
                    + blin_ref[...]).astype(out_ref.dtype)


def _round_up(n, m):
    return ((n + m - 1) // m) * m


def _prep_gate_mat(w, Hp, dtype):
    """(3H, D) PyTorch gate-stacked matrix -> (D, 3*Hp): per-gate padded, transposed."""
    H3, D = w.shape
    H = H3 // 3
    w = w.reshape(3, H, D)
    w = jnp.pad(w, ((0, 0), (0, Hp - H), (0, 0)))
    return jnp.transpose(w, (2, 0, 1)).reshape(D, 3 * Hp).astype(dtype)


def _prep_gate_vec(b, Hp):
    """(3H,) gate-stacked bias -> (1, 3*Hp) f32, per-gate padded."""
    H = b.shape[0] // 3
    b = jnp.pad(b.reshape(3, H), ((0, 0), (0, Hp - H)))
    return b.reshape(1, 3 * Hp).astype(jnp.float32)


def pbgru_forward(x, params, *, t_chunk=16):
    """x: (B, T, I) float32.  Returns (B, T, O)."""
    B, T, I = x.shape
    H3 = params["w_ih"].shape[0]
    H = H3 // 3
    O = params["w_lin"].shape[0]
    thr = BINARIZER_THRESHOLD

    Bp = _round_up(B, 8)           # sublane-aligned batch
    Hp = _round_up(H, 128)         # lane-aligned gate slices / MXU-friendly contraction
    Op = _round_up(O, 128)         # lane-dense output stores
    Tc = max(1, min(t_chunk, T))   # time-chunk size (grid over chunks)
    Tp = _round_up(T, Tc)
    n_chunks = Tp // Tc
    H3p = 3 * Hp

    # --- weights: transpose for right-mult, per-gate pad, cast to bf16 (MXU operands) ---
    wih_t = _prep_gate_mat(params["w_ih"], Hp, jnp.bfloat16)                                   # (I, 3Hp)
    whh_t = _prep_gate_mat(jnp.pad(params["w_hh"], ((0, 0), (0, Hp - H))), Hp, jnp.bfloat16)   # (Hp, 3Hp)
    bih = _prep_gate_vec(params["b_ih"], Hp)                                                   # (1, 3Hp)
    bhh = _prep_gate_vec(params["b_hh"], Hp)                                                   # (1, 3Hp)
    wlin_t = jnp.pad(jnp.transpose(params["w_lin"]),
                     ((0, Hp - H), (0, Op - O))).astype(jnp.bfloat16)                          # (Hp, Op)
    blin = jnp.pad(params["b_lin"], (0, Op - O)).reshape(1, Op).astype(jnp.float32)            # (1, Op)

    # --- piggyback masks: binarize here (exact, strict '>'), ship as bf16 {0,1} ---
    mih_t = _prep_gate_mat((params["m_ih"] > thr).astype(jnp.bfloat16), Hp, jnp.bfloat16)
    mhh_t = _prep_gate_mat(jnp.pad((params["m_hh"] > thr).astype(jnp.bfloat16),
                                   ((0, 0), (0, Hp - H))), Hp, jnp.bfloat16)
    mlin_t = jnp.pad(jnp.transpose((params["m_lin"] > thr).astype(jnp.bfloat16)),
                     ((0, Hp - H), (0, Op - O)))

    # --- time-major, batch/time-padded, flattened input: (Tp*Bp, I) ---
    x_tm = jnp.transpose(x, (1, 0, 2))                              # (T, B, I)
    x_tm = jnp.pad(x_tm, ((0, Tp - T), (0, Bp - B), (0, 0)))        # (Tp, Bp, I)
    x_flat = x_tm.reshape(Tp * Bp, I)

    # --- VMEM budget: actual residency (blocks, weights, masks, scratch, temporaries) ---
    def _nbytes(shape, itemsize):
        n = 1
        for d in shape:
            n *= d
        return n * itemsize

    needed = (
        2 * _nbytes((Tc * Bp, I), 4)                                              # x block (x2 buffers)
        + 2 * _nbytes((Tc * Bp, Op), 4)                                           # out block (x2 buffers)
        + 3 * (_nbytes((I, H3p), 2) + _nbytes((Hp, H3p), 2) + _nbytes((Hp, Op), 2))  # weights+masks+masked scratch
        + 2 * _nbytes((1, H3p), 4) + _nbytes((1, Op), 4)                          # biases
        + _nbytes((Tc, Bp, H3p), 4) + _nbytes((Tc, Bp, Hp), 4) + _nbytes((Bp, Hp), 4)  # gi / h / h_carry scratch
        + _nbytes((Tc * Bp, H3p), 4) + _nbytes((Bp, H3p), 4) + _nbytes((Tc * Bp, Op), 4)  # in-kernel temporaries
    )
    try:
        phys_vmem = int(pltpu.get_tpu_info().vmem_capacity_bytes)
    except Exception:
        phys_vmem = 64 * 1024 * 1024          # conservative fallback: v7x per-TensorCore VMEM
    vmem_cap = phys_vmem - 8 * 1024 * 1024    # leave compiler headroom
    if needed > vmem_cap:
        raise ValueError(
            f"PBGRU kernel VMEM residency ~{needed} B exceeds budget {vmem_cap} B; "
            f"reduce t_chunk (currently {Tc}).")
    vmem_limit = int(min(max(2 * needed, 32 * 1024 * 1024), vmem_cap))

    out_flat = pl.pallas_call(
        _pbgru_kernel,
        out_shape=jax.ShapeDtypeStruct((Tp * Bp, Op), jnp.float32),
        grid=(n_chunks,),
        in_specs=[
            pl.BlockSpec((Tc * Bp, I), lambda t: (t, 0)),      # x chunk (streamed)
            pl.BlockSpec((I, H3p), lambda t: (0, 0)),          # w_ih^T (resident)
            pl.BlockSpec((Hp, H3p), lambda t: (0, 0)),         # w_hh^T
            pl.BlockSpec((1, H3p), lambda t: (0, 0)),          # b_ih
            pl.BlockSpec((1, H3p), lambda t: (0, 0)),          # b_hh
            pl.BlockSpec((Hp, Op), lambda t: (0, 0)),          # w_lin^T
            pl.BlockSpec((1, Op), lambda t: (0, 0)),           # b_lin
            pl.BlockSpec((I, H3p), lambda t: (0, 0)),          # binarized mask ih
            pl.BlockSpec((Hp, H3p), lambda t: (0, 0)),         # binarized mask hh
            pl.BlockSpec((Hp, Op), lambda t: (0, 0)),          # binarized mask lin
        ],
        out_specs=pl.BlockSpec((Tc * Bp, Op), lambda t: (t, 0)),
        scratch_shapes=[
            pltpu.VMEM((Tc, Bp, H3p), jnp.float32),    # gi_s: hoisted input projection
            pltpu.VMEM((Tc, Bp, Hp), jnp.float32),     # h_all_s: hidden states for the head
            pltpu.VMEM((Bp, Hp), jnp.float32),         # h_carry: persists across time chunks
            pltpu.VMEM((I, H3p), jnp.bfloat16),        # masked w_ih (built once)
            pltpu.VMEM((Hp, H3p), jnp.bfloat16),       # masked w_hh (built once)
            pltpu.VMEM((Hp, Op), jnp.bfloat16),        # masked w_lin (built once)
        ],
        compiler_params=pltpu.CompilerParams(
            dimension_semantics=("arbitrary",),        # time chunks are a sequential recurrence
            vmem_limit_bytes=vmem_limit),
    )(x_flat, wih_t, whh_t, bih, bhh, wlin_t, blin, mih_t, mhh_t, mlin_t)

    out = out_flat.reshape(Tp, Bp, Op)[:T, :B, :O]     # drop time/batch/output padding
    return jnp.transpose(out, (1, 0, 2))               # (B, T, O)


def _reference_forward(x, params):
    """Pure-JAX f32 reference of the same math (PyTorch GRU semantics)."""
    H = params["w_hh"].shape[1]
    wih = params["w_ih"] * (params["m_ih"] > BINARIZER_THRESHOLD)
    whh = params["w_hh"] * (params["m_hh"] > BINARIZER_THRESHOLD)
    wlin = params["w_lin"] * (params["m_lin"] > BINARIZER_THRESHOLD)

    def cell(h_prev, x_t):
        gi = x_t @ wih.T + params["b_ih"]
        gh = h_prev @ whh.T + params["b_hh"]
        r = jax.nn.sigmoid(gi[:, :H] + gh[:, :H])
        z = jax.nn.sigmoid(gi[:, H:2 * H] + gh[:, H:2 * H])
        n = jnp.tanh(gi[:, 2 * H:] + r * gh[:, 2 * H:])
        h_new = (1.0 - z) * n + z * h_prev
        return h_new, h_new @ wlin.T + params["b_lin"]

    B = x.shape[0]
    h0 = jnp.zeros((B, H), jnp.float32)
    _, outs = lax.scan(cell, h0, jnp.transpose(x, (1, 0, 2)))
    return jnp.transpose(outs, (1, 0, 2))


def make_params(key, input_size, hidden_size, output_size, mask_scale=1e-2):
    """Deterministic synthetic weights matching PBGRU's __init__ shapes."""
    ks = jax.random.split(key, 9)
    H3 = 3 * hidden_size
    return {
        # gru.weight_ih_l0 / weight_hh_l0 / biases (PyTorch shapes)
        "w_ih": jax.random.normal(ks[0], (H3, input_size), jnp.float32) * 0.2,
        "w_hh": jax.random.normal(ks[1], (H3, hidden_size), jnp.float32) * 0.2,
        "b_ih": jax.random.normal(ks[2], (H3,), jnp.float32) * 0.1,
        "b_hh": jax.random.normal(ks[3], (H3,), jnp.float32) * 0.1,
        # linear.weight / linear.bias
        "w_lin": jax.random.normal(ks[4], (output_size, hidden_size), jnp.float32) * 0.2,
        "b_lin": jax.random.normal(ks[5], (output_size,), jnp.float32) * 0.1,
        # piggyback real-valued masks (mask_init='uniform', mask_scale=1e-2)
        "m_ih": jax.random.uniform(ks[6], (H3, input_size), jnp.float32, 0.0, 2 * mask_scale),
        "m_hh": jax.random.uniform(ks[7], (H3, hidden_size), jnp.float32, 0.0, 2 * mask_scale),
        "m_lin": jax.random.uniform(ks[8], (output_size, hidden_size), jnp.float32, 0.0, 2 * mask_scale),
    }


if __name__ == "__main__":
    B, T, I, H, O = 4, 8, 4, 32, 2   # batch, seq_len, input_size, hidden_size, output_size

    key = jax.random.PRNGKey(0)
    kx, kp = jax.random.split(key)
    x = jax.random.normal(kx, (B, T, I), jnp.float32)
    params = make_params(kp, I, H, O)

    fwd = jax.jit(functools.partial(pbgru_forward, t_chunk=4))   # 2 time chunks -> exercises h carry
    out = jax.block_until_ready(fwd(x, params))

    ref = _reference_forward(x, params)
    assert out.shape == (B, T, O)
    err = float(jnp.max(jnp.abs(out - ref)))
    # bf16 MXU operands with f32 accumulation -> loosened tolerance vs the f32 reference
    assert err < 5e-2, f"mismatch vs reference: max abs err {err}"

    print("KERNEL_OK")
</pallas_src>

<mosaic_0001>
module attributes {stable_mosaic.version = 11 : i64} {
  func.func @_pbgru_kernel(%arg0: i32, %arg1: memref<32x4xf32, #tpu.memory_space<vmem>>, %arg2: memref<4x384xbf16, #tpu.memory_space<vmem>>, %arg3: memref<128x384xbf16, #tpu.memory_space<vmem>>, %arg4: memref<1x384xf32, #tpu.memory_space<vmem>>, %arg5: memref<1x384xf32, #tpu.memory_space<vmem>>, %arg6: memref<128x128xbf16, #tpu.memory_space<vmem>>, %arg7: memref<1x128xf32, #tpu.memory_space<vmem>>, %arg8: memref<4x384xbf16, #tpu.memory_space<vmem>>, %arg9: memref<128x384xbf16, #tpu.memory_space<vmem>>, %arg10: memref<128x128xbf16, #tpu.memory_space<vmem>>, %arg11: memref<32x128xf32, #tpu.memory_space<vmem>>, %arg12: memref<4x8x384xf32, #tpu.memory_space<vmem>>, %arg13: memref<4x8x128xf32, #tpu.memory_space<vmem>>, %arg14: memref<8x128xf32, #tpu.memory_space<vmem>>, %arg15: memref<4x384xbf16, #tpu.memory_space<vmem>>, %arg16: memref<128x384xbf16, #tpu.memory_space<vmem>>, %arg17: memref<128x128xbf16, #tpu.memory_space<vmem>>) attributes {dimension_semantics = [#tpu.dimension_semantics<arbitrary>], iteration_bounds = array<i64: 2>, scalar_prefetch = 0 : i64, scratch_operands = 6 : i64, tpu.core_type = #tpu.core_type<tc>, window_params = [{transform_indices = @transform_0, window_bounds = array<i64: 32, 4>}, {pipeline_mode = #tpu.pipeline_mode<synchronous>, transform_indices = @transform_1, window_bounds = array<i64: 4, 384>}, {pipeline_mode = #tpu.pipeline_mode<synchronous>, transform_indices = @transform_2, window_bounds = array<i64: 128, 384>}, {pipeline_mode = #tpu.pipeline_mode<synchronous>, transform_indices = @transform_3, window_bounds = array<i64: 1, 384>}, {pipeline_mode = #tpu.pipeline_mode<synchronous>, transform_indices = @transform_4, window_bounds = array<i64: 1, 384>}, {pipeline_mode = #tpu.pipeline_mode<synchronous>, transform_indices = @transform_5, window_bounds = array<i64: 128, 128>}, {pipeline_mode = #tpu.pipeline_mode<synchronous>, transform_indices = @transform_6, window_bounds = array<i64: 1, 128>}, {pipeline_mode = #tpu.pipeline_mode<synchronous>, transform_indices = @transform_7, window_bounds = array<i64: 4, 384>}, {pipeline_mode = #tpu.pipeline_mode<synchronous>, transform_indices = @transform_8, window_bounds = array<i64: 128, 384>}, {pipeline_mode = #tpu.pipeline_mode<synchronous>, transform_indices = @transform_9, window_bounds = array<i64: 128, 128>}, {transform_indices = @transform_10, window_bounds = array<i64: 32, 128>}]} {
    %c0_i32 = arith.constant 0 : i32
    %0 = arith.cmpi eq, %arg0, %c0_i32 : i32
    %1 = arith.extui %0 : i1 to i32
    %c0_i32_0 = arith.constant 0 : i32
    %2 = arith.cmpi ne, %1, %c0_i32_0 : i32
    scf.if %2 {
      %cst_66 = arith.constant 0.000000e+00 : f32
      %174 = vector.broadcast %cst_66 : f32 to vector<8x128xf32>
      %c0_67 = arith.constant 0 : index
      %c0_68 = arith.constant 0 : index
      %175 = vector.load %arg14[%c0_67, %c0_68] : memref<8x128xf32, #tpu.memory_space<vmem>>, vector<8x128xf32>
      tpu.vector_store %arg14[%c0_67, %c0_68], %174 {strides = array<i32>} : memref<8x128xf32, #tpu.memory_space<vmem>>, vector<8x128xf32>,
      %c0_69 = arith.constant 0 : index
      %c0_70 = arith.constant 0 : index
      %176 = vector.load %arg2[%c0_69, %c0_70] : memref<4x384xbf16, #tpu.memory_space<vmem>>, vector<4x384xbf16>
      %c0_71 = arith.constant 0 : index
      %c0_72 = arith.constant 0 : index
      %177 = vector.load %arg8[%c0_71, %c0_72] : memref<4x384xbf16, #tpu.memory_space<vmem>>, vector<4x384xbf16>
      %178 = arith.mulf %176, %177 : vector<4x384xbf16>
      %c0_73 = arith.constant 0 : index
      %c0_74 = arith.constant 0 : index
      %179 = vector.load %arg15[%c0_73, %c0_74] : memref<4x384xbf16, #tpu.memory_space<vmem>>, vector<4x384xbf16>
      tpu.vector_store %arg15[%c0_73, %c0_74], %178 {strides = array<i32>} : memref<4x384xbf16, #tpu.memory_space<vmem>>, vector<4x384xbf16>,
      %c0_75 = arith.constant 0 : index
      %c0_76 = arith.constant 0 : index
      %180 = vector.load %arg3[%c0_75, %c0_76] : memref<128x384xbf16, #tpu.memory_space<vmem>>, vector<128x384xbf16>
      %c0_77 = arith.constant 0 : index
      %c0_78 = arith.constant 0 : index
      %181 = vector.load %arg9[%c0_77, %c0_78] : memref<128x384xbf16, #tpu.memory_space<vmem>>, vector<128x384xbf16>
      %182 = arith.mulf %180, %181 : vector<128x384xbf16>
      %c0_79 = arith.constant 0 : index
      %c0_80 = arith.constant 0 : index
      %183 = vector.load %arg16[%c0_79, %c0_80] : memref<128x384xbf16, #tpu.memory_space<vmem>>, vector<128x384xbf16>
      tpu.vector_store %arg16[%c0_79, %c0_80], %182 {strides = array<i32>} : memref<128x384xbf16, #tpu.memory_space<vmem>>, vector<128x384xbf16>,
      %c0_81 = arith.constant 0 : index
      %c0_82 = arith.constant 0 : index
      %184 = vector.load %arg6[%c0_81, %c0_82] : memref<128x128xbf16, #tpu.memory_space<vmem>>, vector<128x128xbf16>
      %c0_83 = arith.constant 0 : index
      %c0_84 = arith.constant 0 : index
      %185 = vector.load %arg10[%c0_83, %c0_84] : memref<128x128xbf16, #tpu.memory_space<vmem>>, vector<128x128xbf16>
      %186 = arith.mulf %184, %185 : vector<128x128xbf16>
      %c0_85 = arith.constant 0 : index
      %c0_86 = arith.constant 0 : index
      %187 = vector.load %arg17[%c0_85, %c0_86] : memref<128x128xbf16, #tpu.memory_space<vmem>>, vector<128x128xbf16>
      tpu.vector_store %arg17[%c0_85, %c0_86], %186 {strides = array<i32>} : memref<128x128xbf16, #tpu.memory_space<vmem>>, vector<128x128xbf16>,
    } else {
    }
    %c0 = arith.constant 0 : index
    %c0_1 = arith.constant 0 : index
    %3 = vector.load %arg1[%c0, %c0_1] : memref<32x4xf32, #tpu.memory_space<vmem>>, vector<32x4xf32>
    %4 = arith.truncf %3 : vector<32x4xf32> to vector<32x4xbf16>
    %c0_2 = arith.constant 0 : index
    %c0_3 = arith.constant 0 : index
    %5 = vector.load %arg15[%c0_2, %c0_3] : memref<4x384xbf16, #tpu.memory_space<vmem>>, vector<4x384xbf16>
    %cst = arith.constant dense<0.000000e+00> : vector<32x384xf32>
    %6 = tpu.matmul %4, %5, %cst {dimension_numbers = #tpu.dot_dimension_numbers<[1], [0], [0], [1], [0, 0, 1, 1], [], []>} : vector<32x4xbf16>, vector<4x384xbf16>, vector<32x384xf32> -> vector<32x384xf32>
    %c0_4 = arith.constant 0 : index
    %c0_5 = arith.constant 0 : index
    %7 = vector.load %arg4[%c0_4, %c0_5] : memref<1x384xf32, #tpu.memory_space<vmem>>, vector<1x384xf32>
    %8 = vector.broadcast %7 : vector<1x384xf32> to vector<32x384xf32>
    %9 = arith.addf %6, %8 : vector<32x384xf32>
    %10 = vector.shape_cast %9 : vector<32x384xf32> to vector<4x8x384xf32>
    %c0_6 = arith.constant 0 : index
    %c0_7 = arith.constant 0 : index
    %c0_8 = arith.constant 0 : index
    %11 = vector.load %arg12[%c0_6, %c0_7, %c0_8] : memref<4x8x384xf32, #tpu.memory_space<vmem>>, vector<4x8x384xf32>
    tpu.vector_store %arg12[%c0_6, %c0_7, %c0_8], %10 {strides = array<i32>} : memref<4x8x384xf32, #tpu.memory_space<vmem>>, vector<4x8x384xf32>,
    %c0_9 = arith.constant 0 : index
    %c0_10 = arith.constant 0 : index
    %12 = vector.load %arg5[%c0_9, %c0_10] : memref<1x384xf32, #tpu.memory_space<vmem>>, vector<1x384xf32>
    %13 = vector.shape_cast %12 : vector<1x384xf32> to vector<1x384xf32>
    %14 = vector.broadcast %13 : vector<1x384xf32> to vector<8x384xf32>
    %c0_11 = arith.constant 0 : index
    %c0_12 = arith.constant 0 : index
    %15 = vector.load %arg14[%c0_11, %c0_12] : memref<8x128xf32, #tpu.memory_space<vmem>>, vector<8x128xf32>
    %c0_i32_13 = arith.constant 0 : i32
    %16 = arith.index_cast %c0_i32_13 : i32 to index
    %c0_14 = arith.constant 0 : index
    %c0_15 = arith.constant 0 : index
    %17 = vector.load %arg12[%16, %c0_14, %c0_15] : memref<4x8x384xf32, #tpu.memory_space<vmem>>, vector<1x8x384xf32>
    %18 = vector.shape_cast %17 : vector<1x8x384xf32> to vector<8x384xf32>
    %19 = arith.truncf %15 : vector<8x128xf32> to vector<8x128xbf16>
    %c0_16 = arith.constant 0 : index
    %c0_17 = arith.constant 0 : index
    %20 = vector.load %arg16[%c0_16, %c0_17] : memref<128x384xbf16, #tpu.memory_space<vmem>>, vector<128x384xbf16>
    %cst_18 = arith.constant dense<0.000000e+00> : vector<8x384xf32>
    %21 = tpu.matmul %19, %20, %cst_18 {dimension_numbers = #tpu.dot_dimension_numbers<[1], [0], [0], [1], [0, 0, 1, 1], [], []>} : vector<8x128xbf16>, vector<128x384xbf16>, vector<8x384xf32> -> vector<8x384xf32>
    %22 = arith.addf %21, %14 : vector<8x384xf32>
    %23 = vector.extract_strided_slice %18 {offsets = [0, 0], sizes = [8, 128], strides = [1, 1]} : vector<8x384xf32> to vector<8x128xf32>
    %24 = vector.extract_strided_slice %22 {offsets = [0, 0], sizes = [8, 128], strides = [1, 1]} : vector<8x384xf32> to vector<8x128xf32>
    %25 = arith.addf %23, %24 : vector<8x128xf32>
    %26 = arith.negf %25 : vector<8x128xf32>
    %27 = math.exp %26 : vector<8x128xf32>
    %cst_19 = arith.constant 1.000000e+00 : f32
    %28 = vector.broadcast %cst_19 : f32 to vector<8x128xf32>
    %29 = arith.addf %28, %27 : vector<8x128xf32>
    %30 = arith.divf %28, %29 : vector<8x128xf32>
    %31 = vector.extract_strided_slice %18 {offsets = [0, 128], sizes = [8, 128], strides = [1, 1]} : vector<8x384xf32> to vector<8x128xf32>
    %32 = vector.extract_strided_slice %22 {offsets = [0, 128], sizes = [8, 128], strides = [1, 1]} : vector<8x384xf32> to vector<8x128xf32>
    %33 = arith.addf %31, %32 : vector<8x128xf32>
    %34 = arith.negf %33 : vector<8x128xf32>
    %35 = math.exp %34 : vector<8x128xf32>
    %cst_20 = arith.constant 1.000000e+00 : f32
    %36 = vector.broadcast %cst_20 : f32 to vector<8x128xf32>
    %37 = arith.addf %36, %35 : vector<8x128xf32>
    %38 = arith.divf %36, %37 : vector<8x128xf32>
    %39 = vector.extract_strided_slice %18 {offsets = [0, 256], sizes = [8, 128], strides = [1, 1]} : vector<8x384xf32> to vector<8x128xf32>
    %40 = vector.extract_strided_slice %22 {offsets = [0, 256], sizes = [8, 128], strides = [1, 1]} : vector<8x384xf32> to vector<8x128xf32>
    %41 = arith.mulf %30, %40 : vector<8x128xf32>
    %42 = arith.addf %39, %41 : vector<8x128xf32>
    %43 = math.tanh %42 : vector<8x128xf32>
    %cst_21 = arith.constant 1.000000e+00 : f32
    %44 = vector.broadcast %cst_21 : f32 to vector<8x128xf32>
    %45 = arith.subf %44, %38 : vector<8x128xf32>
    %46 = arith.mulf %45, %43 : vector<8x128xf32>
    %47 = arith.mulf %38, %15 : vector<8x128xf32>
    %48 = arith.addf %46, %47 : vector<8x128xf32>
    %49 = arith.index_cast %c0_i32_13 : i32 to index
    %c0_22 = arith.constant 0 : index
    %c0_23 = arith.constant 0 : index
    %50 = vector.load %arg13[%49, %c0_22, %c0_23] : memref<4x8x128xf32, #tpu.memory_space<vmem>>, vector<1x8x128xf32>
    %51 = vector.shape_cast %50 : vector<1x8x128xf32> to vector<8x128xf32>
    %52 = vector.shape_cast %48 : vector<8x128xf32> to vector<1x8x128xf32>
    tpu.vector_store %arg13[%49, %c0_22, %c0_23], %52 {strides = array<i32>} : memref<4x8x128xf32, #tpu.memory_space<vmem>>, vector<1x8x128xf32>,
    %c1_i32 = arith.constant 1 : i32
    %53 = arith.index_cast %c1_i32 : i32 to index
    %c0_24 = arith.constant 0 : index
    %c0_25 = arith.constant 0 : index
    %54 = vector.load %arg12[%53, %c0_24, %c0_25] : memref<4x8x384xf32, #tpu.memory_space<vmem>>, vector<1x8x384xf32>
    %55 = vector.shape_cast %54 : vector<1x8x384xf32> to vector<8x384xf32>
    %56 = arith.truncf %48 : vector<8x128xf32> to vector<8x128xbf16>
    %c0_26 = arith.constant 0 : index
    %c0_27 = arith.constant 0 : index
    %57 = vector.load %arg16[%c0_26, %c0_27] : memref<128x384xbf16, #tpu.memory_space<vmem>>, vector<128x384xbf16>
    %cst_28 = arith.constant dense<0.000000e+00> : vector<8x384xf32>
    %58 = tpu.matmul %56, %57, %cst_28 {dimension_numbers = #tpu.dot_dimension_numbers<[1], [0], [0], [1], [0, 0, 1, 1], [], []>} : vector<8x128xbf16>, vector<128x384xbf16>, vector<8x384xf32> -> vector<8x384xf32>
    %59 = arith.addf %58, %14 : vector<8x384xf32>
    %60 = vector.extract_strided_slice %55 {offsets = [0, 0], sizes = [8, 128], strides = [1, 1]} : vector<8x384xf32> to vector<8x128xf32>
    %61 = vector.extract_strided_slice %59 {offsets = [0, 0], sizes = [8, 128], strides = [1, 1]} : vector<8x384xf32> to vector<8x128xf32>
    %62 = arith.addf %60, %61 : vector<8x128xf32>
    %63 = arith.negf %62 : vector<8x128xf32>
    %64 = math.exp %63 : vector<8x128xf32>
    %cst_29 = arith.constant 1.000000e+00 : f32
    %65 = vector.broadcast %cst_29 : f32 to vector<8x128xf32>
    %66 = arith.addf %65, %64 : vector<8x128xf32>
    %67 = arith.divf %65, %66 : vector<8x128xf32>
    %68 = vector.extract_strided_slice %55 {offsets = [0, 128], sizes = [8, 128], strides = [1, 1]} : vector<8x384xf32> to vector<8x128xf32>
    %69 = vector.extract_strided_slice %59 {offsets = [0, 128], sizes = [8, 128], strides = [1, 1]} : vector<8x384xf32> to vector<8x128xf32>
    %70 = arith.addf %68, %69 : vector<8x128xf32>
    %71 = arith.negf %70 : vector<8x128xf32>
    %72 = math.exp %71 : vector<8x128xf32>
    %cst_30 = arith.constant 1.000000e+00 : f32
    %73 = vector.broadcast %cst_30 : f32 to vector<8x128xf32>
    %74 = arith.addf %73, %72 : vector<8x128xf32>
    %75 = arith.divf %73, %74 : vector<8x128xf32>
    %76 = vector.extract_strided_slice %55 {offsets = [0, 256], sizes = [8, 128], strides = [1, 1]} : vector<8x384xf32> to vector<8x128xf32>
    %77 = vector.extract_strided_slice %59 {offsets = [0, 256], sizes = [8, 128], strides = [1, 1]} : vector<8x384xf32> to vector<8x128xf32>
    %78 = arith.mulf %67, %77 : vector<8x128xf32>
    %79 = arith.addf %76, %78 : vector<8x128xf32>
    %80 = math.tanh %79 : vector<8x128xf32>
    %cst_31 = arith.constant 1.000000e+00 : f32
    %81 = vector.broadcast %cst_31 : f32 to vector<8x128xf32>
    %82 = arith.subf %81, %75 : vector<8x128xf32>
    %83 = arith.mulf %82, %80 : vector<8x128xf32>
    %84 = arith.mulf %75, %48 : vector<8x128xf32>
    %85 = arith.addf %83, %84 : vector<8x128xf32>
    %86 = arith.index_cast %c1_i32 : i32 to index
    %c0_32 = arith.constant 0 : index
    %c0_33 = arith.constant 0 : index
    %87 = vector.load %arg13[%86, %c0_32, %c0_33] : memref<4x8x128xf32, #tpu.memory_space<vmem>>, vector<1x8x128xf32>
    %88 = vector.shape_cast %87 : vector<1x8x128xf32> to vector<8x128xf32>
    %89 = vector.shape_cast %85 : vector<8x128xf32> to vector<1x8x128xf32>
    tpu.vector_store %arg13[%86, %c0_32, %c0_33], %89 {strides = array<i32>} : memref<4x8x128xf32, #tpu.memory_space<vmem>>, vector<1x8x128xf32>,
    %c2_i32 = arith.constant 2 : i32
    %90 = arith.index_cast %c2_i32 : i32 to index
    %c0_34 = arith.constant 0 : index
    %c0_35 = arith.constant 0 : index
    %91 = vector.load %arg12[%90, %c0_34, %c0_35] : memref<4x8x384xf32, #tpu.memory_space<vmem>>, vector<1x8x384xf32>
    %92 = vector.shape_cast %91 : vector<1x8x384xf32> to vector<8x384xf32>
    %93 = arith.truncf %85 : vector<8x128xf32> to vector<8x128xbf16>
    %c0_36 = arith.constant 0 : index
    %c0_37 = arith.constant 0 : index
    %94 = vector.load %arg16[%c0_36, %c0_37] : memref<128x384xbf16, #tpu.memory_space<vmem>>, vector<128x384xbf16>
    %cst_38 = arith.constant dense<0.000000e+00> : vector<8x384xf32>
    %95 = tpu.matmul %93, %94, %cst_38 {dimension_numbers = #tpu.dot_dimension_numbers<[1], [0], [0], [1], [0, 0, 1, 1], [], []>} : vector<8x128xbf16>, vector<128x384xbf16>, vector<8x384xf32> -> vector<8x384xf32>
    %96 = arith.addf %95, %14 : vector<8x384xf32>
    %97 = vector.extract_strided_slice %92 {offsets = [0, 0], sizes = [8, 128], strides = [1, 1]} : vector<8x384xf32> to vector<8x128xf32>
    %98 = vector.extract_strided_slice %96 {offsets = [0, 0], sizes = [8, 128], strides = [1, 1]} : vector<8x384xf32> to vector<8x128xf32>
    %99 = arith.addf %97, %98 : vector<8x128xf32>
    %100 = arith.negf %99 : vector<8x128xf32>
    %101 = math.exp %100 : vector<8x128xf32>
    %cst_39 = arith.constant 1.000000e+00 : f32
    %102 = vector.broadcast %cst_39 : f32 to vector<8x128xf32>
    %103 = arith.addf %102, %101 : vector<8x128xf32>
    %104 = arith.divf %102, %103 : vector<8x128xf32>
    %105 = vector.extract_strided_slice %92 {offsets = [0, 128], sizes = [8, 128], strides = [1, 1]} : vector<8x384xf32> to vector<8x128xf32>
    %106 = vector.extract_strided_slice %96 {offsets = [0, 128], sizes = [8, 128], strides = [1, 1]} : vector<8x384xf32> to vector<8x128xf32>
    %107 = arith.addf %105, %106 : vector<8x128xf32>
    %108 = arith.negf %107 : vector<8x128xf32>
    %109 = math.exp %108 : vector<8x128xf32>
    %cst_40 = arith.constant 1.000000e+00 : f32
    %110 = vector.broadcast %cst_40 : f32 to vector<8x128xf32>
    %111 = arith.addf %110, %109 : vector<8x128xf32>
    %112 = arith.divf %110, %111 : vector<8x128xf32>
    %113 = vector.extract_strided_slice %92 {offsets = [0, 256], sizes = [8, 128], strides = [1, 1]} : vector<8x384xf32> to vector<8x128xf32>
    %114 = vector.extract_strided_slice %96 {offsets = [0, 256], sizes = [8, 128], strides = [1, 1]} : vector<8x384xf32> to vector<8x128xf32>
    %115 = arith.mulf %104, %114 : vector<8x128xf32>
    %116 = arith.addf %113, %115 : vector<8x128xf32>
    %117 = math.tanh %116 : vector<8x128xf32>
    %cst_41 = arith.constant 1.000000e+00 : f32
    %118 = vector.broadcast %cst_41 : f32 to vector<8x128xf32>
    %119 = arith.subf %118, %112 : vector<8x128xf32>
    %120 = arith.mulf %119, %117 : vector<8x128xf32>
    %121 = arith.mulf %112, %85 : vector<8x128xf32>
    %122 = arith.addf %120, %121 : vector<8x128xf32>
    %123 = arith.index_cast %c2_i32 : i32 to index
    %c0_42 = arith.constant 0 : index
    %c0_43 = arith.constant 0 : index
    %124 = vector.load %arg13[%123, %c0_42, %c0_43] : memref<4x8x128xf32, #tpu.memory_space<vmem>>, vector<1x8x128xf32>
    %125 = vector.shape_cast %124 : vector<1x8x128xf32> to vector<8x128xf32>
    %126 = vector.shape_cast %122 : vector<8x128xf32> to vector<1x8x128xf32>
    tpu.vector_store %arg13[%123, %c0_42, %c0_43], %126 {strides = array<i32>} : memref<4x8x128xf32, #tpu.memory_space<vmem>>, vector<1x8x128xf32>,
    %c3_i32 = arith.constant 3 : i32
    %127 = arith.index_cast %c3_i32 : i32 to index
    %c0_44 = arith.constant 0 : index
    %c0_45 = arith.constant 0 : index
    %128 = vector.load %arg12[%127, %c0_44, %c0_45] : memref<4x8x384xf32, #tpu.memory_space<vmem>>, vector<1x8x384xf32>
    %129 = vector.shape_cast %128 : vector<1x8x384xf32> to vector<8x384xf32>
    %130 = arith.truncf %122 : vector<8x128xf32> to vector<8x128xbf16>
    %c0_46 = arith.constant 0 : index
    %c0_47 = arith.constant 0 : index
    %131 = vector.load %arg16[%c0_46, %c0_47] : memref<128x384xbf16, #tpu.memory_space<vmem>>, vector<128x384xbf16>
    %cst_48 = arith.constant dense<0.000000e+00> : vector<8x384xf32>
    %132 = tpu.matmul %130, %131, %cst_48 {dimension_numbers = #tpu.dot_dimension_numbers<[1], [0], [0], [1], [0, 0, 1, 1], [], []>} : vector<8x128xbf16>, vector<128x384xbf16>, vector<8x384xf32> -> vector<8x384xf32>
    %133 = arith.addf %132, %14 : vector<8x384xf32>
    %134 = vector.extract_strided_slice %129 {offsets = [0, 0], sizes = [8, 128], strides = [1, 1]} : vector<8x384xf32> to vector<8x128xf32>
    %135 = vector.extract_strided_slice %133 {offsets = [0, 0], sizes = [8, 128], strides = [1, 1]} : vector<8x384xf32> to vector<8x128xf32>
    %136 = arith.addf %134, %135 : vector<8x128xf32>
    %137 = arith.negf %136 : vector<8x128xf32>
    %138 = math.exp %137 : vector<8x128xf32>
    %cst_49 = arith.constant 1.000000e+00 : f32
    %139 = vector.broadcast %cst_49 : f32 to vector<8x128xf32>
    %140 = arith.addf %139, %138 : vector<8x128xf32>
    %141 = arith.divf %139, %140 : vector<8x128xf32>
    %142 = vector.extract_strided_slice %129 {offsets = [0, 128], sizes = [8, 128], strides = [1, 1]} : vector<8x384xf32> to vector<8x128xf32>
    %143 = vector.extract_strided_slice %133 {offsets = [0, 128], sizes = [8, 128], strides = [1, 1]} : vector<8x384xf32> to vector<8x128xf32>
    %144 = arith.addf %142, %143 : vector<8x128xf32>
    %145 = arith.negf %144 : vector<8x128xf32>
    %146 = math.exp %145 : vector<8x128xf32>
    %cst_50 = arith.constant 1.000000e+00 : f32
    %147 = vector.broadcast %cst_50 : f32 to vector<8x128xf32>
    %148 = arith.addf %147, %146 : vector<8x128xf32>
    %149 = arith.divf %147, %148 : vector<8x128xf32>
    %150 = vector.extract_strided_slice %129 {offsets = [0, 256], sizes = [8, 128], strides = [1, 1]} : vector<8x384xf32> to vector<8x128xf32>
    %151 = vector.extract_strided_slice %133 {offsets = [0, 256], sizes = [8, 128], strides = [1, 1]} : vector<8x384xf32> to vector<8x128xf32>
    %152 = arith.mulf %141, %151 : vector<8x128xf32>
    %153 = arith.addf %150, %152 : vector<8x128xf32>
    %154 = math.tanh %153 : vector<8x128xf32>
    %cst_51 = arith.constant 1.000000e+00 : f32
    %155 = vector.broadcast %cst_51 : f32 to vector<8x128xf32>
    %156 = arith.subf %155, %149 : vector<8x128xf32>
    %157 = arith.mulf %156, %154 : vector<8x128xf32>
    %158 = arith.mulf %149, %122 : vector<8x128xf32>
    %159 = arith.addf %157, %158 : vector<8x128xf32>
    %160 = arith.index_cast %c3_i32 : i32 to index
    %c0_52 = arith.constant 0 : index
    %c0_53 = arith.constant 0 : index
    %161 = vector.load %arg13[%160, %c0_52, %c0_53] : memref<4x8x128xf32, #tpu.memory_space<vmem>>, vector<1x8x128xf32>
    %162 = vector.shape_cast %161 : vector<1x8x128xf32> to vector<8x128xf32>
    %163 = vector.shape_cast %159 : vector<8x128xf32> to vector<1x8x128xf32>
    tpu.vector_store %arg13[%160, %c0_52, %c0_53], %163 {strides = array<i32>} : memref<4x8x128xf32, #tpu.memory_space<vmem>>, vector<1x8x128xf32>,
    %c4_i32 = arith.constant 4 : i32
    %c0_54 = arith.constant 0 : index
    %c0_55 = arith.constant 0 : index
    %164 = vector.load %arg14[%c0_54, %c0_55] : memref<8x128xf32, #tpu.memory_space<vmem>>, vector<8x128xf32>
    tpu.vector_store %arg14[%c0_54, %c0_55], %159 {strides = array<i32>} : memref<8x128xf32, #tpu.memory_space<vmem>>, vector<8x128xf32>,
    %c0_56 = arith.constant 0 : index
    %c0_57 = arith.constant 0 : index
    %c0_58 = arith.constant 0 : index
    %165 = vector.load %arg13[%c0_56, %c0_57, %c0_58] : memref<4x8x128xf32, #tpu.memory_space<vmem>>, vector<4x8x128xf32>
    %166 = vector.shape_cast %165 : vector<4x8x128xf32> to vector<32x128xf32>
    %167 = arith.truncf %166 : vector<32x128xf32> to vector<32x128xbf16>
    %c0_59 = arith.constant 0 : index
    %c0_60 = arith.constant 0 : index
    %168 = vector.load %arg17[%c0_59, %c0_60] : memref<128x128xbf16, #tpu.memory_space<vmem>>, vector<128x128xbf16>
    %cst_61 = arith.constant dense<0.000000e+00> : vector<32x128xf32>
    %169 = tpu.matmul %167, %168, %cst_61 {dimension_numbers = #tpu.dot_dimension_numbers<[1], [0], [0], [1], [0, 0, 1, 1], [], []>} : vector<32x128xbf16>, vector<128x128xbf16>, vector<32x128xf32> -> vector<32x128xf32>
    %c0_62 = arith.constant 0 : index
    %c0_63 = arith.constant 0 : index
    %170 = vector.load %arg7[%c0_62, %c0_63] : memref<1x128xf32, #tpu.memory_space<vmem>>, vector<1x128xf32>
    %171 = vector.broadcast %170 : vector<1x128xf32> to vector<32x128xf32>
    %172 = arith.addf %169, %171 : vector<32x128xf32>
    %c0_64 = arith.constant 0 : index
    %c0_65 = arith.constant 0 : index
    %173 = vector.load %arg11[%c0_64, %c0_65] : memref<32x128xf32, #tpu.memory_space<vmem>>, vector<32x128xf32>
    tpu.vector_store %arg11[%c0_64, %c0_65], %172 {strides = array<i32>} : memref<32x128xf32, #tpu.memory_space<vmem>>, vector<32x128xf32>,
    return
  }
  func.func @transform_0(%arg0: i32) -> (i32, i32) {
    %c0_i32 = arith.constant 0 : i32
    %c0_i32_0 = arith.constant 0 : i32
    return %arg0, %c0_i32 : i32, i32
  }
  func.func @transform_1(%arg0: i32) -> (i32, i32) {
    %c0_i32 = arith.constant 0 : i32
    %c0_i32_0 = arith.constant 0 : i32
    %c0_i32_1 = arith.constant 0 : i32
    return %c0_i32, %c0_i32_0 : i32, i32
  }
  func.func @transform_2(%arg0: i32) -> (i32, i32) {
    %c0_i32 = arith.constant 0 : i32
    %c0_i32_0 = arith.constant 0 : i32
    %c0_i32_1 = arith.constant 0 : i32
    return %c0_i32, %c0_i32_0 : i32, i32
  }
  func.func @transform_3(%arg0: i32) -> (i32, i32) {
    %c0_i32 = arith.constant 0 : i32
    %c0_i32_0 = arith.constant 0 : i32
    %c0_i32_1 = arith.constant 0 : i32
    return %c0_i32, %c0_i32_0 : i32, i32
  }
  func.func @transform_4(%arg0: i32) -> (i32, i32) {
    %c0_i32 = arith.constant 0 : i32
    %c0_i32_0 = arith.constant 0 : i32
    %c0_i32_1 = arith.constant 0 : i32
    return %c0_i32, %c0_i32_0 : i32, i32
  }
  func.func @transform_5(%arg0: i32) -> (i32, i32) {
    %c0_i32 = arith.constant 0 : i32
    %c0_i32_0 = arith.constant 0 : i32
    %c0_i32_1 = arith.constant 0 : i32
    return %c0_i32, %c0_i32_0 : i32, i32
  }
  func.func @transform_6(%arg0: i32) -> (i32, i32) {
    %c0_i32 = arith.constant 0 : i32
    %c0_i32_0 = arith.constant 0 : i32
    %c0_i32_1 = arith.constant 0 : i32
    return %c0_i32, %c0_i32_0 : i32, i32
  }
  func.func @transform_7(%arg0: i32) -> (i32, i32) {
    %c0_i32 = arith.constant 0 : i32
    %c0_i32_0 = arith.constant 0 : i32
    %c0_i32_1 = arith.constant 0 : i32
    return %c0_i32, %c0_i32_0 : i32, i32
  }
  func.func @transform_8(%arg0: i32) -> (i32, i32) {
    %c0_i32 = arith.constant 0 : i32
    %c0_i32_0 = arith.constant 0 : i32
    %c0_i32_1 = arith.constant 0 : i32
    return %c0_i32, %c0_i32_0 : i32, i32
  }
  func.func @transform_9(%arg0: i32) -> (i32, i32) {
    %c0_i32 = arith.constant 0 : i32
    %c0_i32_0 = arith.constant 0 : i32
    %c0_i32_1 = arith.constant 0 : i32
    return %c0_i32, %c0_i32_0 : i32, i32
  }
  func.func @transform_10(%arg0: i32) -> (i32, i32) {
    %c0_i32 = arith.constant 0 : i32
    %c0_i32_0 = arith.constant 0 : i32
    return %arg0, %c0_i32 : i32, i32
  }
}

</mosaic_0001>

<bundles_post_ra>
// kernel: pbgru_forward.1
= control target key start
LH: loop header
LB: loop body
LE: loop exit
PB: predicated region body
PF: predicated region fallthrough
CT: control target
= control target key end

     0   :  { %s1912_s13 = smov 0   ;;  %s2516_s0 = inlined_call_operand.vmem [shape: f32[64,4], index: 0, kind: input, shape index: {}]   ;;  %s2517_s1 = inlined_call_operand.vmem [shape: bf16[4,384], index: 1, kind: input, shape index: {}]   ;;  %s2518_s2 = inlined_call_operand.vmem [shape: bf16[128,384], index: 2, kind: input, shape index: {}]   ;;  %s2519_s3 = inlined_call_operand.vmem [shape: f32[1,384], index: 3, kind: input, shape index: {}]   ;;  %s2520_s4 = inlined_call_operand.vmem [shape: f32[1,384], index: 4, kind: input, shape index: {}]   ;;  %s2521_s5 = inlined_call_operand.vmem [shape: bf16[128,128], index: 5, kind: input, shape index: {}]   ;;  %s2522_s6 = inlined_call_operand.vmem [shape: f32[1,128], index: 6, kind: input, shape index: {}]   ;;  %s2523_s7 = inlined_call_operand.vmem [shape: bf16[4,384], index: 7, kind: input, shape index: {}]   ;;  %s2524_s8 = inlined_call_operand.vmem [shape: bf16[128,384], index: 8, kind: input, shape index: {}]   ;;  %s2525_s9 = inlined_call_operand.vmem [shape: bf16[128,128], index: 9, kind: input, shape index: {}]   ;;  %s2526_s10 = inlined_call_operand.vmem [shape: f32[64,128], index: 10, kind: output, shape index: {}]  }
   0x1 LB: > { %s1576_s14 = sadd.s32 4294967295, %s1850_s13   ;;  %p1580_p0 = scmp.ge.s32.totalorder %s1850_s13, 1  ;;  %s1850_s13 = sphi %s1912_s13, %s20_s13  }
   0x2   : > { %p313_p1 = scmp.lt.s32.totalorder %s1850_s13, 3 }
   0x4   : > { %p314_p2 = pnand %p1580_p0, %p313_p1 }
   0x5   : > { %s1581_s15 = sshll.u32 (!%p314_p2), %s1576_s14, 2  ;;  %p1585_p4 = scmp.ne.s32.totalorder (!%p314_p2), %s1576_s14, 0 }
   0x6   : > { %317 = sbr.rel (%p314_p2) target bundleno = 1362 (0x552), region = 60  ;;  %p352_p3 = scmp.lt.s32.totalorder (!%p314_p2), %s1581_s15, 7 }
   0xd   : > { %s2528_s15 = smov (!%p352_p3, %s1581_s15), 7  ;;  %367 = sbr.rel (%p1585_p4) target bundleno = 57 (0x39), region = 64 }
   0xe   : > { %s1582_s16 = sshll.u32 %s2528_s15, 3  ;;  %v369_v0 = vld [vmem:[%s2517_s1] sm:$0x3f] (!%p1585_p4)  ;;  %v1852_v3 = vmov (!%p1585_p4), 0.0   ;;  %v375_v5 = vld [vmem:[%s2518_s2 + $0xc] sm:$0xff] (!%p1585_p4)  ;;  %v377_v15 = vld [vmem:[%s2518_s2 + $0x18] sm:$0xff] (!%p1585_p4) }
   0xf   : > { %s1923_s19 = scalar_lea.vmem %s2516_s0, %s1582_s16  ;;  %s1928_s22 = scalar_lea.vmem %s2526_s10, %s1582_s16  ;;  %v370_v1 = vld [vmem:[%s2523_s7] sm:$0x3f] (!%p1585_p4)  ;;  %368 = vst [vmem:[#allocation4] sm:$0xff] (!%p1585_p4), %v1852_v3  ;;  %v407_v7 = vld [vmem:[%s2524_s8 + $0xc] sm:$0xff] (!%p1585_p4)  ;;  %v374_v10 = vld [vmem:[%s2518_s2 + $0x8] sm:$0xf] (!%p1585_p4) }
  0x10   : > { %v373_v2 = vld [vmem:[%s2518_s2] sm:$0xff] (!%p1585_p4)  ;;  %v371_v4 = vmul.bf16 (!%p1585_p4), %v370_v1, %v369_v0  ;;  %v439_v9 = vmul.bf16 (!%p1585_p4), %v407_v7, %v375_v5  ;;  %v376_v11 = vld [vmem:[%s2518_s2 + $0x14] sm:$0xf] (!%p1585_p4)  ;;  %v406_v12 = vld [vmem:[%s2524_s8 + $0x8] sm:$0xf] (!%p1585_p4) }
  0x11   : > { %v405_v6 = vld [vmem:[%s2524_s8] sm:$0xff] (!%p1585_p4)  ;;  %v408_v13 = vld [vmem:[%s2524_s8 + $0x14] sm:$0xf] (!%p1585_p4)  ;;  %v438_v14 = vmul.bf16 (!%p1585_p4), %v406_v12, %v374_v10  ;;  %v409_v20 = vld [vmem:[%s2524_s8 + $0x18] sm:$0xff] (!%p1585_p4) }
  0x12   : > { %v437_v8 = vmul.bf16 (!%p1585_p4), %v405_v6, %v373_v2  ;;  %372 = vst [vmem:[#allocation5] sm:$0x3f] (!%p1585_p4), %v371_v4  ;;  %v379_v16 = vld [vmem:[%s2518_s2 + $0x24] sm:$0xff] (!%p1585_p4)  ;;  %v440_v19 = vmul.bf16 (!%p1585_p4), %v408_v13, %v376_v11  ;;  %v378_v22 = vld [vmem:[%s2518_s2 + $0x20] sm:$0xf] (!%p1585_p4)  ;;  %v441_v23 = vmul.bf16 (!%p1585_p4), %v409_v20, %v377_v15  ;;  %v381_v31 = vld [vmem:[%s2518_s2 + $0x30] sm:$0xff] (!%p1585_p4) }
  0x13   : > { %v411_v21 = vld [vmem:[%s2524_s8 + $0x24] sm:$0xff] (!%p1585_p4)  ;;  %v380_v25 = vld [vmem:[%s2518_s2 + $0x2c] sm:$0xf] (!%p1585_p4)  ;;  %v410_v26 = vld [vmem:[%s2524_s8 + $0x20] sm:$0xf] (!%p1585_p4) }
  0x14   : > { %v1586_v17 = vcombine.low %v437_v8, %v439_v9  ;;  %v1587_v18 = vcombine.high %v437_v8, %v439_v9  ;;  %v443_v24 = vmul.bf16 %v411_v21, %v379_v16  ;;  %v412_v27 = vld [vmem:[%s2524_s8 + $0x2c] sm:$0xf]  ;;  %v1588_v28 = vcombine.low %v438_v14, %v440_v19  ;;  %v383_v32 = vld [vmem:[%s2518_s2 + $0x3c] sm:$0xff]  ;;  %v413_v33 = vld [vmem:[%s2524_s8 + $0x30] sm:$0xff] }
  0x15   : > { %v442_v29 = vmul.bf16 %v410_v26, %v378_v22  ;;  %v444_v30 = vmul.bf16 %v412_v27, %v380_v25  ;;  %v415_v36 = vld [vmem:[%s2524_s8 + $0x3c] sm:$0xff]  ;;  %v445_v37 = vmul.bf16 %v413_v33, %v381_v31  ;;  %v382_v38 = vld [vmem:[%s2518_s2 + $0x38] sm:$0xf]  ;;  %v384_v39 = vld [vmem:[%s2518_s2 + $0x44] sm:$0xf] }
  0x16   : > { %597 = vst [vmem:[#allocation6] sm:$0xff] %v1586_v17  ;;  %598 = vst [vmem:[#allocation6 + $0x8] sm:$0xff] %v1587_v18  ;;  %v1589_v34 = vcombine.low %v441_v23, %v443_v24  ;;  %v1590_v35 = vcombine.high %v441_v23, %v443_v24  ;;  %v447_v41 = vmul.bf16 %v415_v36, %v383_v32  ;;  %v414_v42 = vld [vmem:[%s2524_s8 + $0x38] sm:$0xf]  ;;  %v416_v43 = vld [vmem:[%s2524_s8 + $0x44] sm:$0xf] }
  0x17   : > { %599 = vst [vmem:[#allocation6 + $0x10] sm:$0xff] %v1588_v28  ;;  %v1591_v40 = vcombine.low %v442_v29, %v444_v30  ;;  %v385_v44 = vld [vmem:[%s2518_s2 + $0x48] sm:$0xff]  ;;  %v446_v45 = vmul.bf16 %v414_v42, %v382_v38  ;;  %v448_v46 = vmul.bf16 %v416_v43, %v384_v39  ;;  %v387_v47 = vld [vmem:[%s2518_s2 + $0x54] sm:$0xff]  ;;  %v386_v54 = vld [vmem:[%s2518_s2 + $0x50] sm:$0xf] }
  0x18   : > { %600 = vst [vmem:[#allocation6 + $0x18] sm:$0xff] %v1589_v34  ;;  %601 = vst [vmem:[#allocation6 + $0x20] sm:$0xff] %v1590_v35  ;;  %v417_v48 = vld [vmem:[%s2524_s8 + $0x48] sm:$0xff]  ;;  %v419_v49 = vld [vmem:[%s2524_s8 + $0x54] sm:$0xff]  ;;  %v1592_v50 = vcombine.low %v445_v37, %v447_v41  ;;  %v1593_v51 = vcombine.high %v445_v37, %v447_v41 }
  0x19   : > { %602 = vst [vmem:[#allocation6 + $0x28] sm:$0xff] %v1591_v40  ;;  %v449_v52 = vmul.bf16 %v417_v48, %v385_v44  ;;  %v451_v53 = vmul.bf16 %v419_v49, %v387_v47  ;;  %v388_v55 = vld [vmem:[%s2518_s2 + $0x5c] sm:$0xf]  ;;  %v418_v56 = vld [vmem:[%s2524_s8 + $0x50] sm:$0xf]  ;;  %v1594_v57 = vcombine.low %v446_v45, %v448_v46  ;;  %v389_v60 = vld [vmem:[%s2518_s2 + $0x60] sm:$0xff] }
  0x1a   : > { %v420_v58 = vld [vmem:[%s2524_s8 + $0x5c] sm:$0xf]  ;;  %v450_v59 = vmul.bf16 %v418_v56, %v386_v54  ;;  %v391_v61 = vld [vmem:[%s2518_s2 + $0x6c] sm:$0xff]  ;;  %603 = vst [vmem:[#allocation6 + $0x30] sm:$0xff] %v1592_v50  ;;  %604 = vst [vmem:[#allocation6 + $0x38] sm:$0xff] %v1593_v51 }
  0x1b   : > { %v1595_v62 = vcombine.low %v449_v52, %v451_v53  ;;  %v1596_v63 = vcombine.high %v449_v52, %v451_v53  ;;  %v452_v0 = vmul.bf16 %v420_v58, %v388_v55  ;;  %v421_v1 = vld [vmem:[%s2524_s8 + $0x60] sm:$0xff]  ;;  %v423_v2 = vld [vmem:[%s2524_s8 + $0x6c] sm:$0xff]  ;;  %v390_v3 = vld [vmem:[%s2518_s2 + $0x68] sm:$0xf]  ;;  %605 = vst [vmem:[#allocation6 + $0x40] sm:$0xff] %v1594_v57 }
  0x1c   : > { %v453_v4 = vmul.bf16 %v421_v1, %v389_v60  ;;  %v455_v5 = vmul.bf16 %v423_v2, %v391_v61  ;;  %v392_v6 = vld [vmem:[%s2518_s2 + $0x74] sm:$0xf]  ;;  %v422_v7 = vld [vmem:[%s2524_s8 + $0x68] sm:$0xf]  ;;  %v393_v12 = vld [vmem:[%s2518_s2 + $0x78] sm:$0xff] }
  0x1d   : > { %v424_v8 = vld [vmem:[%s2524_s8 + $0x74] sm:$0xf]  ;;  %606 = vst [vmem:[#allocation6 + $0x48] sm:$0xff] %v1595_v62  ;;  %607 = vst [vmem:[#allocation6 + $0x50] sm:$0xff] %v1596_v63  ;;  %v1597_v9 = vcombine.low %v450_v59, %v452_v0  ;;  %v454_v10 = vmul.bf16 %v422_v7, %v390_v3  ;;  %v395_v13 = vld [vmem:[%s2518_s2 + $0x84] sm:$0xff] }
  0x1e   : > { %v456_v11 = vmul.bf16 %v424_v8, %v392_v6  ;;  %v425_v14 = vld [vmem:[%s2524_s8 + $0x78] sm:$0xff]  ;;  %v1598_v15 = vcombine.low %v453_v4, %v455_v5  ;;  %v1599_v16 = vcombine.high %v453_v4, %v455_v5  ;;  %v427_v17 = vld [vmem:[%s2524_s8 + $0x84] sm:$0xff]  ;;  %v394_v19 = vld [vmem:[%s2518_s2 + $0x80] sm:$0xf] }
  0x1f   : > { %v457_v18 = vmul.bf16 %v425_v14, %v393_v12  ;;  %v396_v20 = vld [vmem:[%s2518_s2 + $0x8c] sm:$0xf]  ;;  %608 = vst [vmem:[#allocation6 + $0x58] sm:$0xff] %v1597_v9  ;;  %v459_v22 = vmul.bf16 %v427_v17, %v395_v13  ;;  %v426_v23 = vld [vmem:[%s2524_s8 + $0x80] sm:$0xf]  ;;  %v397_v25 = vld [vmem:[%s2518_s2 + $0x90] sm:$0xff] }
  0x20   : > { %v1600_v21 = vcombine.low %v454_v10, %v456_v11  ;;  %v428_v24 = vld [vmem:[%s2524_s8 + $0x8c] sm:$0xf]  ;;  %609 = vst [vmem:[#allocation6 + $0x60] sm:$0xff] %v1598_v15  ;;  %610 = vst [vmem:[#allocation6 + $0x68] sm:$0xff] %v1599_v16  ;;  %v458_v26 = vmul.bf16 %v426_v23, %v394_v19  ;;  %v399_v28 = vld [vmem:[%s2518_s2 + $0x9c] sm:$0xff] }
  0x21   : > { %v460_v27 = vmul.bf16 %v428_v24, %v396_v20  ;;  %v429_v29 = vld [vmem:[%s2524_s8 + $0x90] sm:$0xff]  ;;  %v431_v30 = vld [vmem:[%s2524_s8 + $0x9c] sm:$0xff]  ;;  %v1601_v31 = vcombine.low %v457_v18, %v459_v22  ;;  %v1602_v32 = vcombine.high %v457_v18, %v459_v22  ;;  %v398_v35 = vld [vmem:[%s2518_s2 + $0x98] sm:$0xf] }
  0x22   : > { %611 = vst [vmem:[#allocation6 + $0x70] sm:$0xff] %v1600_v21  ;;  %v461_v33 = vmul.bf16 %v429_v29, %v397_v25  ;;  %v463_v34 = vmul.bf16 %v431_v30, %v399_v28  ;;  %v400_v36 = vld [vmem:[%s2518_s2 + $0xa4] sm:$0xf]  ;;  %v430_v37 = vld [vmem:[%s2524_s8 + $0x98] sm:$0xf]  ;;  %v401_v41 = vld [vmem:[%s2518_s2 + $0xa8] sm:$0xff] }
  0x23   : > { %v1603_v38 = vcombine.low %v458_v26, %v460_v27  ;;  %v432_v39 = vld [vmem:[%s2524_s8 + $0xa4] sm:$0xf]  ;;  %v462_v40 = vmul.bf16 %v430_v37, %v398_v35  ;;  %v403_v42 = vld [vmem:[%s2518_s2 + $0xb4] sm:$0xff]  ;;  %612 = vst [vmem:[#allocation6 + $0x78] sm:$0xff] %v1601_v31  ;;  %613 = vst [vmem:[#allocation6 + $0x80] sm:$0xff] %v1602_v32 }
  0x24   : > { %v1604_v43 = vcombine.low %v461_v33, %v463_v34  ;;  %v1605_v44 = vcombine.high %v461_v33, %v463_v34  ;;  %v464_v45 = vmul.bf16 %v432_v39, %v400_v36  ;;  %v433_v46 = vld [vmem:[%s2524_s8 + $0xa8] sm:$0xff]  ;;  %v435_v47 = vld [vmem:[%s2524_s8 + $0xb4] sm:$0xff]  ;;  %v402_v48 = vld [vmem:[%s2518_s2 + $0xb0] sm:$0xf] }
  0x25   : > { %614 = vst [vmem:[#allocation6 + $0x88] sm:$0xff] %v1603_v38  ;;  %v465_v49 = vmul.bf16 %v433_v46, %v401_v41  ;;  %v467_v50 = vmul.bf16 %v435_v47, %v403_v42  ;;  %v404_v51 = vld [vmem:[%s2518_s2 + $0xbc] sm:$0xf]  ;;  %v434_v52 = vld [vmem:[%s2524_s8 + $0xb0] sm:$0xf] }
  0x26   : > { %v436_v53 = vld [vmem:[%s2524_s8 + $0xbc] sm:$0xf]  ;;  %615 = vst [vmem:[#allocation6 + $0x90] sm:$0xff] %v1604_v43  ;;  %616 = vst [vmem:[#allocation6 + $0x98] sm:$0xff] %v1605_v44  ;;  %v1606_v54 = vcombine.low %v462_v40, %v464_v45  ;;  %v466_v55 = vmul.bf16 %v434_v52, %v402_v48  ;;  %v621_v57 = vld [vmem:[%s2521_s5] sm:$0xf] }
  0x27   : > { %v468_v56 = vmul.bf16 %v436_v53, %v404_v51  ;;  %v622_v58 = vld [vmem:[%s2521_s5 + $0x4] sm:$0xf]  ;;  %v637_v59 = vld [vmem:[%s2525_s9] sm:$0xf]  ;;  %v1607_v60 = vcombine.low %v465_v49, %v467_v50  ;;  %v1608_v61 = vcombine.high %v465_v49, %v467_v50  ;;  %v623_v0 = vld [vmem:[%s2521_s5 + $0x8] sm:$0xf] }
  0x28   : > { %v638_v62 = vld [vmem:[%s2525_s9 + $0x4] sm:$0xf]  ;;  %v653_v63 = vmul.bf16 %v637_v59, %v621_v57  ;;  %v624_v1 = vld [vmem:[%s2521_s5 + $0xc] sm:$0xf]  ;;  %617 = vst [vmem:[#allocation6 + $0xa0] sm:$0xff] %v1606_v54 }
  0x29   : > { %v1609_v2 = vcombine.low %v466_v55, %v468_v56  ;;  %v654_v3 = vmul.bf16 %v638_v62, %v622_v58  ;;  %v639_v4 = vld [vmem:[%s2525_s9 + $0x8] sm:$0xf]  ;;  %v640_v5 = vld [vmem:[%s2525_s9 + $0xc] sm:$0xf]  ;;  %v625_v6 = vld [vmem:[%s2521_s5 + $0x10] sm:$0xf] }
  0x2a   : > { %618 = vst [vmem:[#allocation6 + $0xa8] sm:$0xff] %v1607_v60  ;;  %619 = vst [vmem:[#allocation6 + $0xb0] sm:$0xff] %v1608_v61  ;;  %v655_v7 = vmul.bf16 %v639_v4, %v623_v0  ;;  %v656_v8 = vmul.bf16 %v640_v5, %v624_v1  ;;  %v626_v9 = vld [vmem:[%s2521_s5 + $0x14] sm:$0xf]  ;;  %v641_v10 = vld [vmem:[%s2525_s9 + $0x10] sm:$0xf] }
  0x2b   : > { %v642_v11 = vld [vmem:[%s2525_s9 + $0x14] sm:$0xf]  ;;  %620 = vst [vmem:[#allocation6 + $0xb8] sm:$0xff] %v1609_v2  ;;  %v1610_v12 = vcombine.low %v653_v63, %v654_v3  ;;  %v657_v13 = vmul.bf16 %v641_v10, %v625_v6  ;;  %v627_v15 = vld [vmem:[%s2521_s5 + $0x18] sm:$0xf] }
  0x2c   : > { %v658_v14 = vmul.bf16 %v642_v11, %v626_v9  ;;  %v628_v16 = vld [vmem:[%s2521_s5 + $0x1c] sm:$0xf]  ;;  %v643_v17 = vld [vmem:[%s2525_s9 + $0x18] sm:$0xf]  ;;  %v1611_v18 = vcombine.low %v655_v7, %v656_v8  ;;  %v629_v21 = vld [vmem:[%s2521_s5 + $0x20] sm:$0xf] }
  0x2d   : > { %v644_v19 = vld [vmem:[%s2525_s9 + $0x1c] sm:$0xf]  ;;  %v659_v20 = vmul.bf16 %v643_v17, %v627_v15  ;;  %v630_v22 = vld [vmem:[%s2521_s5 + $0x24] sm:$0xf]  ;;  %717 = vst [vmem:[#allocation7] sm:$0xff] %v1610_v12 }
  0x2e   : > { %v1612_v23 = vcombine.low %v657_v13, %v658_v14  ;;  %v660_v24 = vmul.bf16 %v644_v19, %v628_v16  ;;  %v645_v25 = vld [vmem:[%s2525_s9 + $0x20] sm:$0xf]  ;;  %v646_v26 = vld [vmem:[%s2525_s9 + $0x24] sm:$0xf]  ;;  %v631_v27 = vld [vmem:[%s2521_s5 + $0x28] sm:$0xf] }
  0x2f   : > { %718 = vst [vmem:[#allocation7 + $0x8] sm:$0xff] %v1611_v18  ;;  %v661_v28 = vmul.bf16 %v645_v25, %v629_v21  ;;  %v662_v29 = vmul.bf16 %v646_v26, %v630_v22  ;;  %v632_v30 = vld [vmem:[%s2521_s5 + $0x2c] sm:$0xf]  ;;  %v647_v31 = vld [vmem:[%s2525_s9 + $0x28] sm:$0xf] }
  0x30   : > { %v648_v32 = vld [vmem:[%s2525_s9 + $0x2c] sm:$0xf]  ;;  %719 = vst [vmem:[#allocation7 + $0x10] sm:$0xff] %v1612_v23  ;;  %v1613_v33 = vcombine.low %v659_v20, %v660_v24  ;;  %v663_v34 = vmul.bf16 %v647_v31, %v631_v27  ;;  %v633_v36 = vld [vmem:[%s2521_s5 + $0x30] sm:$0xf] }
  0x31   : > { %v664_v35 = vmul.bf16 %v648_v32, %v632_v30  ;;  %v634_v37 = vld [vmem:[%s2521_s5 + $0x34] sm:$0xf]  ;;  %v649_v38 = vld [vmem:[%s2525_s9 + $0x30] sm:$0xf]  ;;  %v1614_v39 = vcombine.low %v661_v28, %v662_v29  ;;  %v635_v42 = vld [vmem:[%s2521_s5 + $0x38] sm:$0xf] }
  0x32   : > { %v650_v40 = vld [vmem:[%s2525_s9 + $0x34] sm:$0xf]  ;;  %v665_v41 = vmul.bf16 %v649_v38, %v633_v36  ;;  %v636_v43 = vld [vmem:[%s2521_s5 + $0x3c] sm:$0xf]  ;;  %720 = vst [vmem:[#allocation7 + $0x18] sm:$0xff] %v1613_v33 }
  0x33   : > { %v1615_v44 = vcombine.low %v663_v34, %v664_v35  ;;  %v666_v45 = vmul.bf16 %v650_v40, %v634_v37  ;;  %v651_v46 = vld [vmem:[%s2525_s9 + $0x38] sm:$0xf]  ;;  %v652_v47 = vld [vmem:[%s2525_s9 + $0x3c] sm:$0xf]  ;;  %721 = vst [vmem:[#allocation7 + $0x20] sm:$0xff] %v1614_v39 }
  0x34   : > { %v667_v48 = vmul.bf16 %v651_v46, %v635_v42  ;;  %v668_v49 = vmul.bf16 %v652_v47, %v636_v43 }
  0x35   : > { %722 = vst [vmem:[#allocation7 + $0x28] sm:$0xff] %v1615_v44  ;;  %v1616_v50 = vcombine.low %v665_v41, %v666_v45 }
  0x36   : > { %v1617_v51 = vcombine.low %v667_v48, %v668_v49 }
  0x37   : > { %723 = vst [vmem:[#allocation7 + $0x30] sm:$0xff] %v1616_v50 }
  0x38   : > { %724 = vst [vmem:[#allocation7 + $0x38] sm:$0xff] %v1617_v51 }
  0x39 PF: > { %v2224_v52 = vld [vmem:[#allocation6 + $0x8] sm:$0xff]  ;;  %v2226_v53 = vld [vmem:[#allocation6] sm:$0xff]  ;;  %v734_v55 = vlaneseq  ;;  %v1853_v56 = vmov 1983009808   ;;  %v1854_v59 = vmov 0   ;;  %v2236_v60 = vld [vmem:[#allocation6 + $0x18] sm:$0xff] }
  0x3a   : > { %v2228_v54 = vld [vmem:[#allocation6 + $0x20] sm:$0xff]  ;;  %943 = vmatprep.subr.bf16.mxu0 %v2224_v52  ;;  %v752_v57 = vunpack.c.l.s4 %v1853_v56  ;;  %815 = vmatprep.mubr.bf16.mxu1 %v1854_v59  ;;  %v2239_v62 = vld [vmem:[#allocation6 + $0x38] sm:$0xff]  ;;  %vm773_vm0 = vcmask 1041408   ;;  %v2244_v2 = vld [vmem:[#allocation6 + $0x30] sm:$0xff]  ;;  %vm766_vm1 = vcmask 31744   ;;  %v1855_v18 = vmov 0.0  }
  0x3b   : > { %944 = vmatpush1.bf16.msra.mxu0 %v2226_v53  ;;  %v2232_v58 = vshrl.u32 %v734_v55, 7  ;;  %975 = vmatprep.mubr.bf16.mxu0 %v1854_v59  ;;  %v2246_v4 = vld [vmem:[#allocation6 + $0x50] sm:$0xff]  ;;  %v726_v6 = vld [vmem:[%s1923_s19 + $0x8] sm:$0xff]  ;;  %v2254_v10 = vld [vmem:[#allocation6 + $0x48] sm:$0xff]  ;;  %vm1856_vm2 = vmmov 0  }
  0x3c   : > { %945 = vmatprep.subr.bf16.mxu0 %v2228_v54  ;;  %v753_v61 = vunpack.c.0.s8 %v752_v57  ;;  %v725_v5 = vld [vmem:[%s1923_s19] sm:$0xff]  ;;  %v2256_v12 = vld [vmem:[#allocation6 + $0x68] sm:$0xff]  ;;  %v2263_v14 = vld [vmem:[#allocation6 + $0x60] sm:$0xff] }
  0x3d   : > { %v729_v11 = vpack.c.bf16 %v726_v6, %v725_v5  ;;  %v2265_v15 = vld [vmem:[#allocation6 + $0x80] sm:$0xff]  ;;  %v728_v17 = vld [vmem:[%s1923_s19 + $0x18] sm:$0xff]  ;;  %v2273_v19 = vld [vmem:[#allocation6 + $0x78] sm:$0xff]  ;;  %v736_v35 = vsub.s32 0, %v2232_v58  ;;  %v740_v37 = vsub.s32 1, %v2232_v58  ;;  %v744_v49 = vsub.s32 2, %v2232_v58 }
  0x3e   : > { %v731_v63 = vld [vmem:[#allocation5] sm:$0x3f]  ;;  %v756_v1 = vsub.s32 %v753_v61, %v2232_v58  ;;  %v727_v16 = vld [vmem:[%s1923_s19 + $0x10] sm:$0xff]  ;;  %v2280_v22 = vld [vmem:[#allocation6 + $0x90] sm:$0xff] }
  0x3f   : > { %v750_v0 = vcombine.high %v731_v63, %v731_v63  ;;  %946 = vmatpush1.bf16.msra.mxu0 %v2236_v60  ;;  %v730_v20 = vpack.c.bf16 %v728_v17, %v727_v16  ;;  %v2275_v21 = vld [vmem:[#allocation6 + $0x98] sm:$0xff]  ;;  %v2282_v23 = vld [vmem:[#allocation6 + $0xb0] sm:$0xff]  ;;  %v2289_v25 = vld [vmem:[#allocation6 + $0xa8] sm:$0xff] }
  0x40   : > { %947 = vmatprep.subr.bf16.mxu0 %v2239_v62  ;;  %v757_v3 = vrot.slane %v731_v63, %v756_v1  ;;  %v2286_v24 = vld [vmem:[#allocation4] sm:$0xff]  ;;  %v2302_v28 = vld [vmem:[#allocation6 + $0x28] sm:$0xff]  ;;  %v2309_v29 = vld [vmem:[#allocation6 + $0x40] sm:$0xff] }
  0x41   : > { %v764_v9 = vrot.slane %v750_v0, %v756_v1  ;;  %v2291_v26 = vld [vmem:[#allocation6 + $0x10] sm:$0xff]  ;;  %v918_v27 = vpack.c.bf16 %v2286_v24, %v2286_v24  ;;  %v2315_v30 = vld [vmem:[#allocation6 + $0x58] sm:$0xff]  ;;  %v2327_v32 = vld [vmem:[#allocation6 + $0x88] sm:$0xff] }
  0x42   : > { %v765_v7 = vcombine.high %v757_v3, %v757_v3  ;;  %v775_v8 = vsel %vm773_vm0, %v757_v3, 0  ;;  %v2321_v31 = vld [vmem:[#allocation6 + $0x70] sm:$0xff]  ;;  %v2333_v33 = vld [vmem:[#allocation6 + $0xa0] sm:$0xff]  ;;  %v2339_v34 = vld [vmem:[#allocation6 + $0xb8] sm:$0xff] }
  0x43   : > { %948 = vmatpush1.bf16.msra.mxu0 %v2244_v2  ;;  %v781_v13 = vsel %vm773_vm0, %v764_v9, 0  ;;  %v732_v36 = vld [vmem:[%s2519_s3] sm:$0x7] }
  0x44   : > { %1618 = vmatprep.subr.msk.bf16.mxu1 %vm773_vm0, %v765_v7  ;;  %949 = vmatprep.subr.bf16.mxu0 %v2246_v4  ;;  %v737_v39 = vrot.slane %v732_v36, %v736_v35  ;;  %v741_v41 = vrot.slane %v732_v36, %v740_v37  ;;  %v897_v61 = vld [vmem:[%s2520_s4] sm:$0x7]  ;;  %v745_v63 = vrot.slane %v732_v36, %v744_v49 }
  0x45   : > { %784 = vmatpush1.bf16.msra.mxu1 %v775_v8  ;;  %v2386_v0 = vrot.slane %v897_v61, %v736_v35  ;;  %v2388_v3 = vrot.slane %v897_v61, %v740_v37 }
  0x46   : > { %1789 = vmatprep.subr.msk.bf16.mxu1 %vm773_vm0, %v764_v9 }
  0x47   : > { %950 = vmatpush1.bf16.msra.mxu0 %v2254_v10 }
  0x48   : > { %1619 = vmatmul.mubr.msk.bf16.vlgmr.msra.gmra.mrb[0].mxu1 %vm766_vm1, %v729_v11  ;;  %951 = vmatprep.subr.bf16.mxu0 %v2256_v12 }
  0x49   : > { %1684 = vmatpush3.bf16.msra.mxu1 %v781_v13  ;;  %825 = vmatprep.mubr.bf16.mxu1 %v1854_v59 }
  0x4a   : > { %1689 = vmatprep.subr.bf16.mxu1 %v1855_v18 }
  0x4b   : > { %952 = vmatpush1.bf16.msra.mxu0 %v2263_v14 }
  0x4c   : > { %953 = vmatprep.subr.bf16.mxu0 %v2265_v15 }
  0x4f   : > { %954 = vmatpush1.bf16.msra.mxu0 %v2273_v19 }
  0x50   : > { %1620 = vmatmul.mubr.msk.bf16.gmra.mrb[4].mxu1 %vm766_vm1, %v730_v20  ;;  %955 = vmatprep.subr.bf16.mxu0 %v2275_v21 }
  0x51   : > { %1685 = vmatprep.mubr.msk.bf16.mxu1 %vm766_vm1, %v729_v11 }
  0x53   : > { %956 = vmatpush1.bf16.msra.mxu0 %v2280_v22 }
  0x54   : > { %957 = vmatprep.subr.bf16.mxu0 %v2282_v23 }
  0x57   : > { %958 = vmatpush1.bf16.msra.mxu0 %v2289_v25 }
  0x58   : > { %1686 = vmatmul.mubr.msk.bf16.vlgmr.msra.gmra.mrb[8].mxu1 %vm766_vm1, %v730_v20  ;;  %1075 = vmatprep.subr.bf16.mxu0 %v2224_v52 }
  0x59   : > { %1690 = vmatpush3.bf16.msra.mxu1 %v2291_v26  ;;  %1705 = vmatprep.mubr.msk.bf16.mxu1 %vm1856_vm2, %v1855_v18 }
  0x5a   : > { %976 = vmatmul.mubr.bf16.vlgmr.msra.gmra.mrb[0].mxu0 %v918_v27  ;;  %1691 = vmatprep.subr.bf16.mxu1 %v1855_v18 }
  0x5b   : > { %1076 = vmatpush1.bf16.msra.mxu0 %v2226_v53  ;;  %1107 = vmatprep.mubr.bf16.mxu0 %v1854_v59 }
  0x5c   : > { %1077 = vmatprep.subr.bf16.mxu0 %v2228_v54 }
  0x5d   : > { %1692 = vmatpush3.bf16.msra.mxu1 %v2302_v28 }
  0x5e   : > { %1693 = vmatprep.subr.bf16.mxu1 %v1855_v18 }
  0x5f   : > { %1078 = vmatpush1.bf16.msra.mxu0 %v2236_v60 }
  0x60   : > { %1079 = vmatprep.subr.bf16.mxu0 %v2239_v62 }
  0x61   : > { %1694 = vmatpush3.bf16.msra.mxu1 %v2309_v29 }
  0x62   : > { %1695 = vmatprep.subr.bf16.mxu1 %v1855_v18 }
  0x63   : > { %1080 = vmatpush1.bf16.msra.mxu0 %v2244_v2 }
  0x64   : > { %1081 = vmatprep.subr.bf16.mxu0 %v2246_v4 }
  0x65   : > { %1696 = vmatpush3.bf16.msra.mxu1 %v2315_v30 }
  0x66   : > { %1697 = vmatprep.subr.bf16.mxu1 %v1855_v18 }
  0x67   : > { %1082 = vmatpush1.bf16.msra.mxu0 %v2254_v10 }
  0x68   : > { %1083 = vmatprep.subr.bf16.mxu0 %v2256_v12 }
  0x69   : > { %1698 = vmatpush3.bf16.msra.mxu1 %v2321_v31 }
  0x6a   : > { %1699 = vmatprep.subr.bf16.mxu1 %v1855_v18 }
  0x6b   : > { %1084 = vmatpush1.bf16.msra.mxu0 %v2263_v14 }
  0x6c   : > { %1085 = vmatprep.subr.bf16.mxu0 %v2265_v15 }
  0x6d   : > { %1700 = vmatpush3.bf16.msra.mxu1 %v2327_v32 }
  0x6e   : > { %1701 = vmatprep.subr.bf16.mxu1 %v1855_v18 }
  0x6f   : > { %1086 = vmatpush1.bf16.msra.mxu0 %v2273_v19 }
  0x70   : > { %1087 = vmatprep.subr.bf16.mxu0 %v2275_v21 }
  0x71   : > { %1702 = vmatpush3.bf16.msra.mxu1 %v2333_v33 }
  0x72   : > { %1703 = vmatprep.subr.bf16.mxu1 %v1855_v18 }
  0x73   : > { %1088 = vmatpush1.bf16.msra.mxu0 %v2280_v22 }
  0x74   : > { %1089 = vmatprep.subr.bf16.mxu0 %v2282_v23 }
  0x75   : > { %1704 = vmatpush3.bf16.msra.mxu1 %v2339_v34 }
  0x76   : > { %1709 = vmatprep.subr.bf16.mxu1 %v1855_v18 }
  0x77   : > { %1090 = vmatpush1.bf16.msra.mxu0 %v2289_v25 }
  0x78   : > { %1706 = vmatmul.mubr.bf16.vlgmr.msra.gmra.mrb[12].mxu1 %v918_v27  ;;  %1208 = vmatprep.subr.bf16.mxu0 %v2224_v52 }
  0x79   : > { %1710 = vmatpush3.bf16.msra.mxu1 %v2291_v26  ;;  %1725 = vmatprep.mubr.msk.bf16.mxu1 %vm1856_vm2, %v1855_v18 }
  0x7a   : > { %1711 = vmatprep.subr.bf16.mxu1 %v1855_v18 }
  0x7d   : > { %1712 = vmatpush3.bf16.msra.mxu1 %v2302_v28 }
  0x7e   : > { %1713 = vmatprep.subr.bf16.mxu1 %v1855_v18 }
  0x81   : > { %1714 = vmatpush3.bf16.msra.mxu1 %v2309_v29 }
  0x82   : > { %1715 = vmatprep.subr.bf16.mxu1 %v1855_v18 }
  0x85   : > { %1716 = vmatpush3.bf16.msra.mxu1 %v2315_v30 }
  0x86   : > { %1717 = vmatprep.subr.bf16.mxu1 %v1855_v18 }
  0x89   : > { %1718 = vmatpush3.bf16.msra.mxu1 %v2321_v31 }
  0x8a   : > { %1719 = vmatprep.subr.bf16.mxu1 %v1855_v18 }
  0x8d   : > { %1720 = vmatpush3.bf16.msra.mxu1 %v2327_v32 }
  0x8e   : > { %1721 = vmatprep.subr.bf16.mxu1 %v1855_v18 }
  0x91   : > { %1722 = vmatpush3.bf16.msra.mxu1 %v2333_v33 }
  0x92   : > { %1723 = vmatprep.subr.bf16.mxu1 %v1855_v18 }
  0x95   : > { %1724 = vmatpush3.bf16.msra.mxu1 %v2339_v34 }
  0x96   : > { %1729 = vmatprep.subr.bf16.mxu1 %v1855_v18 }
 0x11b   : > { %v817_v38 = vpop.f32.mrb[0].mxu1 }
 0x11c   : > { %v819_v40 = vpop.f32.mrb[1].mxu1  ;;  %v818_v8 = vadd.f32 %v817_v38, %v737_v39 }
 0x11d   : > { %v821_v42 = vpop.f32.mrb[2].mxu1  ;;  %v820_v17 = vadd.f32 %v819_v40, %v741_v41 }
 0x11e   : > { %v2370_v43 = vadd.f32 %v821_v42, %v737_v39  ;;  %v823_v44 = vpop.f32.mrb[3].mxu1 }
 0x11f   : > { %v2372_v45 = vadd.f32 %v823_v44, %v741_v41 }
 0x123   : > { %v827_v46 = vpop.f32.mrb[4].mxu1 }
 0x124   : > { %v2374_v47 = vadd.f32 %v827_v46, %v737_v39  ;;  %v829_v48 = vpop.f32.mrb[5].mxu1 }
 0x125   : > { %v2377_v50 = vadd.f32 %v829_v48, %v741_v41  ;;  %v831_v51 = vpop.f32.mrb[6].mxu1 }
 0x126   : > { %v2379_v55 = vadd.f32 %v831_v51, %v737_v39  ;;  %v833_v56 = vpop.f32.mrb[7].mxu1  ;;  %v2398_v51 = vrot.slane %v897_v61, %v744_v49 }
 0x127   : > { %v2381_v57 = vadd.f32 %v833_v56, %v741_v41 }
 0x12b   : > { %v1687_v1 = vpop.f32.mrb[8].mxu1 }
 0x12c   : > { %v2390_v5 = vadd.f32 %v1687_v1, %v745_v63  ;;  %v870_v58 = vpop.f32.mrb[9].mxu1 }
 0x12d   : > { %v1688_v6 = vpop.f32.mrb[10].mxu1  ;;  %v977_v7 = vpop.f32.mrb[0].mxu0 }
 0x12e   : > { %v2392_v9 = vadd.f32 %v1688_v6, %v745_v63  ;;  %v978_v11 = vadd.f32 %v977_v7, %v2386_v0  ;;  %v873_v13 = vpop.f32.mrb[11].mxu1  ;;  %v979_v16 = vpop.f32.mrb[1].mxu0 }
 0x12f   : > { %v2395_v20 = vadd.f32 %v873_v13, %v745_v63  ;;  %v980_v27 = vadd.f32 %v979_v16, %v2388_v3  ;;  %v981_v35 = vpop.f32.mrb[2].mxu0 }
 0x130   : > { %v1024_v36 = vadd.f32 %v978_v11, %v818_v8  ;;  %v982_v37 = vpop.f32.mrb[3].mxu0  ;;  %v871_v8 = vadd.f32 %v870_v58, %v745_v63 }
 0x131   : > { %v1031_v42 = vadd.f32 %v980_v27, %v820_v17 }
 0x132   : > { %v1623_v44 = vmul.f32 -1.442695, %v1024_v36 }
 0x133   : > { %v1624_v46 = vmul.f32 -1.442695, %v1031_v42 }
 0x134   : > { %1804 = vpow2.f32 %v1623_v44 }
 0x135   : > { %1806 = vpow2.f32 %v1624_v46 }
 0x13e   : > { %v1805_v38 = vpop.eup %1804 }
 0x13f   : > { %v1028_v39 = vadd.f32 1.0, %v1805_v38  ;;  %v1807_v48 = vpop.eup %1806 }
 0x140   : > { %v1035_v56 = vadd.f32 1.0, %v1807_v48 }
 0x141   : > { %1808 = vrcp.f32 %v1028_v39 }
 0x142   : > { %1810 = vrcp.f32 %v1035_v56 }
 0x14b   : > { %v1809_v40 = vpop.eup %1808  ;;  %v1018_v41 = vpop.f32.mrb[12].mxu1 }
 0x14c   : > { %v1019_v1 = vadd.f32 %v1018_v41, %v2398_v51  ;;  %v1707_v6 = vpop.f32.mrb[13].mxu1  ;;  %v1811_v17 = vpop.eup %1810 }
 0x14d   : > { %v1021_v7 = vpop.f32.mrb[14].mxu1  ;;  %v1041_v27 = vsub.f32 1.0, %v1811_v17  ;;  %v1043_v49 = vmul.f32 %v1811_v17, %v2286_v24 }
 0x14e   : > { %v1038_v11 = vmul.f32 %v1809_v40, %v1019_v1  ;;  %v1708_v13 = vpop.f32.mrb[15].mxu1 }
 0x150   : > { %v1039_v16 = vadd.f32 %v1038_v11, %v871_v8 }
 0x152   : > { %1812 = vtanh.f32 %v1039_v16 }
 0x15c   : > { %v1813_v35 = vpop.eup %1812 }
 0x15d   : > { %v1042_v36 = vmul.f32 %v1813_v35, %v1041_v27 }
 0x15f   : > { %v2402_v61 = vadd.f32 %v1043_v49, %v1042_v36 }
 0x161   : > { %v1050_v37 = vpack.c.bf16 %v2402_v61, %v2402_v61 }
 0x163   : > { %1108 = vmatmul.mubr.bf16.vlgmr.msra.gmra.mrb[4].mxu0 %v1050_v37  ;;  %1726 = vmatmul.mubr.bf16.vlgmr.msra.gmra.mrb[16].mxu1 %v1050_v37 }
 0x164   : > { %1209 = vmatpush1.bf16.msra.mxu0 %v2226_v53  ;;  %1730 = vmatpush3.bf16.msra.mxu1 %v2291_v26 }
 0x165   : > { %1210 = vmatprep.subr.bf16.mxu0 %v2228_v54  ;;  %1731 = vmatprep.subr.bf16.mxu1 %v1855_v18 }
 0x166   : > { %1240 = vmatprep.mubr.bf16.mxu0 %v1854_v59  ;;  %1745 = vmatprep.mubr.msk.bf16.mxu1 %vm1856_vm2, %v1855_v18 }
 0x168   : > { %1211 = vmatpush1.bf16.msra.mxu0 %v2236_v60  ;;  %1732 = vmatpush3.bf16.msra.mxu1 %v2302_v28 }
 0x169   : > { %1212 = vmatprep.subr.bf16.mxu0 %v2239_v62  ;;  %1733 = vmatprep.subr.bf16.mxu1 %v1855_v18 }
 0x16c   : > { %1213 = vmatpush1.bf16.msra.mxu0 %v2244_v2  ;;  %1734 = vmatpush3.bf16.msra.mxu1 %v2309_v29 }
 0x16d   : > { %1214 = vmatprep.subr.bf16.mxu0 %v2246_v4  ;;  %1735 = vmatprep.subr.bf16.mxu1 %v1855_v18 }
 0x170   : > { %1215 = vmatpush1.bf16.msra.mxu0 %v2254_v10  ;;  %1736 = vmatpush3.bf16.msra.mxu1 %v2315_v30 }
 0x171   : > { %1216 = vmatprep.subr.bf16.mxu0 %v2256_v12  ;;  %1737 = vmatprep.subr.bf16.mxu1 %v1855_v18 }
 0x174   : > { %1217 = vmatpush1.bf16.msra.mxu0 %v2263_v14  ;;  %1738 = vmatpush3.bf16.msra.mxu1 %v2321_v31 }
 0x175   : > { %1218 = vmatprep.subr.bf16.mxu0 %v2265_v15  ;;  %1739 = vmatprep.subr.bf16.mxu1 %v1855_v18 }
 0x178   : > { %1219 = vmatpush1.bf16.msra.mxu0 %v2273_v19  ;;  %1740 = vmatpush3.bf16.msra.mxu1 %v2327_v32 }
 0x179   : > { %1220 = vmatprep.subr.bf16.mxu0 %v2275_v21  ;;  %1741 = vmatprep.subr.bf16.mxu1 %v1855_v18 }
 0x17c   : > { %1221 = vmatpush1.bf16.msra.mxu0 %v2280_v22  ;;  %1742 = vmatpush3.bf16.msra.mxu1 %v2333_v33 }
 0x17d   : > { %1222 = vmatprep.subr.bf16.mxu0 %v2282_v23  ;;  %1743 = vmatprep.subr.bf16.mxu1 %v1855_v18 }
 0x180   : > { %1223 = vmatpush1.bf16.msra.mxu0 %v2289_v25  ;;  %1744 = vmatpush3.bf16.msra.mxu1 %v2339_v34 }
 0x181   : > { %1341 = vmatprep.subr.bf16.mxu0 %v2224_v52  ;;  %1749 = vmatprep.subr.bf16.mxu1 %v1855_v18 }
 0x236   : > { %v1109_v24 = vpop.f32.mrb[4].mxu0  ;;  %v1150_v63 = vpop.f32.mrb[16].mxu1 }
 0x237   : > { %v1110_v58 = vadd.f32 %v1109_v24, %v2386_v0  ;;  %v1111_v42 = vpop.f32.mrb[5].mxu0  ;;  %v1727_v44 = vpop.f32.mrb[17].mxu1  ;;  %v1151_v13 = vadd.f32 %v1150_v63, %v2398_v51 }
 0x238   : > { %v1112_v46 = vadd.f32 %v1111_v42, %v2388_v3  ;;  %v1113_v38 = vpop.f32.mrb[6].mxu0  ;;  %v1153_v39 = vpop.f32.mrb[18].mxu1  ;;  %v1452_v42 = vld [vmem:[#allocation7] sm:$0xff]  ;;  %v1454_v44 = vld [vmem:[#allocation7 + $0x10] sm:$0xff] }
 0x239   : > { %v1156_v48 = vadd.f32 %v1110_v58, %v2370_v43  ;;  %v1114_v56 = vpop.f32.mrb[7].mxu0  ;;  %v1728_v40 = vpop.f32.mrb[19].mxu1  ;;  %v1456_v38 = vld [vmem:[#allocation7 + $0x20] sm:$0xff]  ;;  %v1457_v39 = vld [vmem:[#allocation7 + $0x28] sm:$0xff] }
 0x23a   : > { %v1163_v41 = vadd.f32 %v1112_v46, %v2372_v45  ;;  %v1455_v46 = vld [vmem:[#allocation7 + $0x18] sm:$0xff] }
 0x23b   : > { %v1625_v1 = vmul.f32 -1.442695, %v1156_v48  ;;  %v1459_v48 = vld [vmem:[#allocation7 + $0x38] sm:$0xff] }
 0x23c   : > { %v1626_v52 = vmul.f32 -1.442695, %v1163_v41 }
 0x23d   : > { %1814 = vpow2.f32 %v1625_v1 }
 0x23e   : > { %1816 = vpow2.f32 %v1626_v52 }
 0x247   : > { %v1815_v6 = vpop.eup %1814 }
 0x248   : > { %v1160_v7 = vadd.f32 1.0, %v1815_v6  ;;  %v1817_v8 = vpop.eup %1816 }
 0x249   : > { %v1167_v11 = vadd.f32 1.0, %v1817_v8 }
 0x24a   : > { %1818 = vrcp.f32 %v1160_v7 }
 0x24b   : > { %1820 = vrcp.f32 %v1167_v11 }
 0x254   : > { %v1819_v16 = vpop.eup %1818 }
 0x255   : > { %v1170_v17 = vmul.f32 %v1819_v16, %v1151_v13  ;;  %v1821_v27 = vpop.eup %1820 }
 0x256   : > { %v1173_v35 = vsub.f32 1.0, %v1821_v27  ;;  %v1175_v49 = vmul.f32 %v1821_v27, %v2402_v61 }
 0x257   : > { %v1171_v43 = vadd.f32 %v1170_v17, %v2395_v20 }
 0x259   : > { %1822 = vtanh.f32 %v1171_v43 }
 0x263   : > { %v1823_v45 = vpop.eup %1822 }
 0x264   : > { %v1174_v36 = vmul.f32 %v1823_v45, %v1173_v35 }
 0x266   : > { %v2448_v37 = vadd.f32 %v1175_v49, %v1174_v36 }
 0x268   : > { %v1183_v24 = vpack.c.bf16 %v2448_v37, %v2448_v37  ;;  %v1450_v58 = vpack.c.bf16 %v2448_v37, %v2402_v61  ;;  %v1458_v61 = vld [vmem:[#allocation7 + $0x30] sm:$0xff] }
 0x26a   : > { %1241 = vmatmul.mubr.bf16.vlgmr.msra.gmra.mrb[8].mxu0 %v1183_v24  ;;  %1746 = vmatmul.mubr.bf16.vlgmr.msra.gmra.mrb[20].mxu1 %v1183_v24 }
 0x26b   : > { %1342 = vmatpush1.bf16.msra.mxu0 %v2226_v53  ;;  %1750 = vmatpush3.bf16.msra.mxu1 %v2291_v26 }
 0x26c   : > { %1343 = vmatprep.subr.bf16.mxu0 %v2228_v54  ;;  %1751 = vmatprep.subr.bf16.mxu1 %v1855_v18 }
 0x26d   : > { %1373 = vmatprep.mubr.bf16.mxu0 %v1854_v59  ;;  %1765 = vmatprep.mubr.msk.bf16.mxu1 %vm1856_vm2, %v1855_v18 }
 0x26f   : > { %1344 = vmatpush1.bf16.msra.mxu0 %v2236_v60  ;;  %1752 = vmatpush3.bf16.msra.mxu1 %v2302_v28 }
 0x270   : > { %1345 = vmatprep.subr.bf16.mxu0 %v2239_v62  ;;  %1753 = vmatprep.subr.bf16.mxu1 %v1855_v18 }
 0x273   : > { %1346 = vmatpush1.bf16.msra.mxu0 %v2244_v2  ;;  %1754 = vmatpush3.bf16.msra.mxu1 %v2309_v29 }
 0x274   : > { %1347 = vmatprep.subr.bf16.mxu0 %v2246_v4  ;;  %1755 = vmatprep.subr.bf16.mxu1 %v1855_v18 }
 0x277   : > { %1348 = vmatpush1.bf16.msra.mxu0 %v2254_v10  ;;  %1756 = vmatpush3.bf16.msra.mxu1 %v2315_v30 }
 0x278   : > { %1349 = vmatprep.subr.bf16.mxu0 %v2256_v12  ;;  %1757 = vmatprep.subr.bf16.mxu1 %v1855_v18 }
 0x27b   : > { %1350 = vmatpush1.bf16.msra.mxu0 %v2263_v14  ;;  %1758 = vmatpush3.bf16.msra.mxu1 %v2321_v31 }
 0x27c   : > { %1351 = vmatprep.subr.bf16.mxu0 %v2265_v15  ;;  %1759 = vmatprep.subr.bf16.mxu1 %v1855_v18 }
 0x27f   : > { %1352 = vmatpush1.bf16.msra.mxu0 %v2273_v19  ;;  %1760 = vmatpush3.bf16.msra.mxu1 %v2327_v32 }
 0x280   : > { %1353 = vmatprep.subr.bf16.mxu0 %v2275_v21  ;;  %1761 = vmatprep.subr.bf16.mxu1 %v1855_v18 }
 0x283   : > { %1354 = vmatpush1.bf16.msra.mxu0 %v2280_v22  ;;  %1762 = vmatpush3.bf16.msra.mxu1 %v2333_v33 }
 0x284   : > { %1355 = vmatprep.subr.bf16.mxu0 %v2282_v23  ;;  %1763 = vmatprep.subr.bf16.mxu1 %v1855_v18 }
 0x287   : > { %1356 = vmatpush1.bf16.msra.mxu0 %v2289_v25  ;;  %1764 = vmatpush3.bf16.msra.mxu1 %v2339_v34 }
 0x288   : > { %1769 = vmatprep.subr.bf16.mxu0 %v1452_v42 }
 0x33d   : > { %v1242_v53 = vpop.f32.mrb[8].mxu0  ;;  %v1283_v54 = vpop.f32.mrb[20].mxu1 }
 0x33e   : > { %v1243_v59 = vadd.f32 %v1242_v53, %v2386_v0  ;;  %v1244_v60 = vpop.f32.mrb[9].mxu0  ;;  %v1747_v62 = vpop.f32.mrb[21].mxu1  ;;  %v1284_v28 = vadd.f32 %v1283_v54, %v2398_v51 }
 0x33f   : > { %v1245_v2 = vadd.f32 %v1244_v60, %v2388_v3  ;;  %v1246_v4 = vpop.f32.mrb[10].mxu0  ;;  %v1286_v10 = vpop.f32.mrb[22].mxu1 }
 0x340   : > { %v1289_v12 = vadd.f32 %v1243_v59, %v2374_v47  ;;  %v1247_v14 = vpop.f32.mrb[11].mxu0  ;;  %v1748_v15 = vpop.f32.mrb[23].mxu1 }
 0x341   : > { %v1296_v18 = vadd.f32 %v1245_v2, %v2377_v50 }
 0x342   : > { %v1627_v19 = vmul.f32 -1.442695, %v1289_v12 }
 0x343   : > { %v1628_v21 = vmul.f32 -1.442695, %v1296_v18 }
 0x344   : > { %1824 = vpow2.f32 %v1627_v19 }
 0x345   : > { %1826 = vpow2.f32 %v1628_v21 }
 0x34e   : > { %v1825_v22 = vpop.eup %1824 }
 0x34f   : > { %v1293_v23 = vadd.f32 1.0, %v1825_v22  ;;  %v1827_v25 = vpop.eup %1826 }
 0x350   : > { %v1300_v26 = vadd.f32 1.0, %v1827_v25 }
 0x351   : > { %1828 = vrcp.f32 %v1293_v23 }
 0x352   : > { %1830 = vrcp.f32 %v1300_v26 }
 0x35b   : > { %v1829_v29 = vpop.eup %1828 }
 0x35c   : > { %v1303_v30 = vmul.f32 %v1829_v29, %v1284_v28  ;;  %v1831_v32 = vpop.eup %1830 }
 0x35d   : > { %v1306_v33 = vsub.f32 1.0, %v1831_v32  ;;  %v1308_v50 = vmul.f32 %v1831_v32, %v2448_v37 }
 0x35e   : > { %v1304_v31 = vadd.f32 %v1303_v30, %v2390_v5  ;;  %v1453_v5 = vld [vmem:[#allocation7 + $0x8] sm:$0xff] }
 0x360   : > { %1832 = vtanh.f32 %v1304_v31 }
 0x36a   : > { %v1833_v34 = vpop.eup %1832 }
 0x36b   : > { %v1307_v47 = vmul.f32 %v1833_v34, %v1306_v33 }
 0x36d   : > { %v2492_v20 = vadd.f32 %v1308_v50, %v1307_v47 }
 0x36f   : > { %v1316_v63 = vpack.c.bf16 %v2492_v20, %v2492_v20 }
 0x371   : > { %1374 = vmatmul.mubr.bf16.vlgmr.msra.gmra.mrb[12].mxu0 %v1316_v63  ;;  %1766 = vmatmul.mubr.bf16.vlgmr.msra.gmra.mrb[24].mxu1 %v1316_v63 }
 0x372   : > { %1785 = vmatprep.mubr.bf16.mxu0 %v1450_v58  ;;  %1770 = vmatpush3.bf16.msra.mxu0 %v1452_v42 }
 0x373   : > { %1771 = vmatprep.subr.bf16.mxu0 %v1453_v5 }
 0x376   : > { %1772 = vmatpush3.bf16.msra.mxu0 %v1453_v5 }
 0x377   : > { %1773 = vmatprep.subr.bf16.mxu0 %v1454_v44 }
 0x37a   : > { %1774 = vmatpush3.bf16.msra.mxu0 %v1454_v44 }
 0x37b   : > { %1775 = vmatprep.subr.bf16.mxu0 %v1455_v46 }
 0x37e   : > { %1776 = vmatpush3.bf16.msra.mxu0 %v1455_v46 }
 0x37f   : > { %1777 = vmatprep.subr.bf16.mxu0 %v1456_v38 }
 0x382   : > { %1778 = vmatpush3.bf16.msra.mxu0 %v1456_v38 }
 0x383   : > { %1779 = vmatprep.subr.bf16.mxu0 %v1457_v39 }
 0x386   : > { %1780 = vmatpush3.bf16.msra.mxu0 %v1457_v39 }
 0x387   : > { %1781 = vmatprep.subr.bf16.mxu0 %v1458_v61 }
 0x38a   : > { %1782 = vmatpush3.bf16.msra.mxu0 %v1458_v61 }
 0x38b   : > { %1783 = vmatprep.subr.bf16.mxu0 %v1459_v48 }
 0x38e   : > { %1784 = vmatpush3.bf16.msra.mxu0 %v1459_v48 }
 0x444   : > { %v1375_v56 = vpop.f32.mrb[12].mxu0  ;;  %v1416_v40 = vpop.f32.mrb[24].mxu1 }
 0x445   : > { %v1376_v41 = vadd.f32 %v1375_v56, %v2386_v0  ;;  %v1377_v1 = vpop.f32.mrb[13].mxu0  ;;  %v1767_v52 = vpop.f32.mrb[25].mxu1  ;;  %v1417_v49 = vadd.f32 %v1416_v40, %v2398_v51 }
 0x446   : > { %v1378_v6 = vadd.f32 %v1377_v1, %v2388_v3  ;;  %v1379_v7 = vpop.f32.mrb[14].mxu0  ;;  %v1419_v8 = vpop.f32.mrb[26].mxu1 }
 0x447   : > { %v1422_v11 = vadd.f32 %v1376_v41, %v2379_v55  ;;  %v1380_v13 = vpop.f32.mrb[15].mxu0  ;;  %v1768_v16 = vpop.f32.mrb[27].mxu1 }
 0x448   : > { %v1429_v17 = vadd.f32 %v1378_v6, %v2381_v57 }
 0x449   : > { %v1629_v43 = vmul.f32 -1.442695, %v1422_v11 }
 0x44a   : > { %v1630_v27 = vmul.f32 -1.442695, %v1429_v17 }
 0x44b   : > { %1834 = vpow2.f32 %v1629_v43 }
 0x44c   : > { %1836 = vpow2.f32 %v1630_v27 }
 0x455   : > { %v1835_v35 = vpop.eup %1834 }
 0x456   : > { %v1426_v45 = vadd.f32 1.0, %v1835_v35  ;;  %v1837_v0 = vpop.eup %1836 }
 0x457   : > { %v1433_v36 = vadd.f32 1.0, %v1837_v0 }
 0x458   : > { %1838 = vrcp.f32 %v1426_v45 }
 0x459   : > { %1840 = vrcp.f32 %v1433_v36 }
 0x462   : > { %v1839_v3 = vpop.eup %1838 }
 0x463   : > { %v1436_v37 = vmul.f32 %v1839_v3, %v1417_v49  ;;  %v1841_v24 = vpop.eup %1840 }
 0x464   : > { %v1439_v57 = vsub.f32 1.0, %v1841_v24  ;;  %v1441_v59 = vmul.f32 %v1841_v24, %v2492_v20 }
 0x465   : > { %v1437_v55 = vadd.f32 %v1436_v37, %v2392_v9  ;;  %v1631_v9 = vld [vmem:[%s2522_s6] ss:$0 sm:$0xff] }
 0x467   : > { %1842 = vtanh.f32 %v1437_v55 }
 0x471   : > { %v1843_v53 = vpop.eup %1842 }
 0x472   : > { %v1440_v54 = vmul.f32 %v1843_v53, %v1439_v57 }
 0x474   : > { %v1442_v60 = vadd.f32 %v1441_v59, %v1440_v54 }
 0x476   : > { %1445 = vst [vmem:[#allocation4] sm:$0xff] %v1442_v60  ;;  %v1451_v51 = vpack.c.bf16 %v1442_v60, %v2492_v20 }
 0x478   : > { %1786 = vmatmul.mubr.bf16.vlgmr.msra.gmra.mrb[16].mxu0 %v1451_v51 }
 0x54b   : > { %v1787_v62 = vpop.f32.mrb[16].mxu0 }
 0x54c   : > { %v1501_v2 = vpop.f32.mrb[17].mxu0  ;;  %v1510_v15 = vadd.f32 %v1787_v62, %v1631_v9 }
 0x54d   : > { %v1502_v4 = vadd.f32 %v1631_v9, %v1501_v2  ;;  %v1788_v10 = vpop.f32.mrb[18].mxu0 }
 0x54e   : > { %v1504_v12 = vpop.f32.mrb[19].mxu0  ;;  %v1513_v18 = vadd.f32 %v1788_v10, %v1631_v9  ;;  %1518 = vst [vmem:[%s1928_s22 + $0x10] sm:$0xff] %v1510_v15 }
 0x54f   : > { %1516 = vst [vmem:[%s1928_s22] sm:$0xff] %v1502_v4  ;;  %v1505_v14 = vadd.f32 %v1631_v9, %v1504_v12 }
 0x550   : > { %1519 = vst [vmem:[%s1928_s22 + $0x18] sm:$0xff] %v1513_v18 }
 0x551   : > { %1517 = vst [vmem:[%s1928_s22 + $0x8] sm:$0xff] %v1505_v14 }
 0x552 PF: > { %s20_s13 = sadd.s32 1, %s1850_s13  }
 0x553   : > { %p17_p5 = scmp.ge.s32.totalorder %s20_s13, 4  }
 0x555   :  { %19 = sbr.rel (!%p17_p5) target bundleno = 1 (0x1), region = 100 }

</bundles_post_ra>
